<compile_context>
chip_gen: v7x
topology: tpu7x:2x2x1
jax: 0.10.0
libtpu: 0.0.40
codegen_flags: <defaults>
</compile_context>

<pallas_src>
import math
import numpy as np

import jax
import jax.numpy as jnp
from jax.experimental import pallas as pl
from jax.experimental.pallas import tpu as pltpu

# ---- small, deterministic problem sizes ----
T = 8    # sequence length
B = 2    # batch
H = 32   # hidden_size
O = 5    # output_size
V = 50   # input_size (vocab size of the embedding)


def bigru_attention_kernel(
    emb_ref, sel_ref, selT_ref, toh_ref,                 # (T*B,H), (T*B,B), (B,T*B), (T*B,T)
    wih_f_ref, bih_f_ref, whh_f_ref, bhh_f_ref,          # fwd GRU: (H,3H),(1,3H),(H,3H),(1,3H)
    wih_b_ref, bih_b_ref, whh_b_ref, bhh_b_ref,          # bwd GRU
    wah_ref, wae_ref, ba_ref, v_ref,                     # attention: (H,H),(2H,H),(1,H),(1,H)
    fcw_ref, fcb_ref,                                    # fc: (2H,O), (1,O)
    out_ref, hidden_ref, attnw_ref,                      # outputs: (B,O), (2,B,H), (B,1,T)
    gif_ref, gib_ref, encf_ref, encb_ref,                # VMEM scratch
):
    batch = attnw_ref.shape[0]
    t_len = attnw_ref.shape[2]
    hid = wah_ref.shape[0]
    h2 = 2 * hid

    # ---- (1) hoisted input-to-hidden projections: one batched matmul per direction ----
    emb = emb_ref[...]                                              # (T*B, H)
    gif_ref[...] = (jnp.dot(emb, wih_f_ref[...], preferred_element_type=jnp.float32)
                    + bih_f_ref[...])
    gib_ref[...] = (jnp.dot(emb, wih_b_ref[...], preferred_element_type=jnp.float32)
                    + bih_b_ref[...])

    # Only the recurrent weights/biases (used every step) are hoisted into registers.
    whh_f = whh_f_ref[...]
    whh_b = whh_b_ref[...]
    bhh_f = jnp.broadcast_to(bhh_f_ref[...], (batch, 3 * hid))
    bhh_b = jnp.broadcast_to(bhh_b_ref[...], (batch, 3 * hid))

    # ---- (2) interleaved forward/backward recurrence (the only serial part) ----
    h_f = jnp.zeros((batch, hid), jnp.float32)
    h_b = jnp.zeros((batch, hid), jnp.float32)
    for t in range(t_len):
        tb = t_len - 1 - t
        gi_f = gif_ref[t * batch:(t + 1) * batch, :]                # (B, 3H)
        gi_b = gib_ref[tb * batch:(tb + 1) * batch, :]
        gh_f = jnp.dot(h_f, whh_f, preferred_element_type=jnp.float32) + bhh_f
        gh_b = jnp.dot(h_b, whh_b, preferred_element_type=jnp.float32) + bhh_b
        # gate order r, z, n; r and z share one sigmoid over a 2H-wide slab
        rz_f = jax.nn.sigmoid(gi_f[:, :h2] + gh_f[:, :h2])
        rz_b = jax.nn.sigmoid(gi_b[:, :h2] + gh_b[:, :h2])
        n_f = jnp.tanh(gi_f[:, h2:] + rz_f[:, :hid] * gh_f[:, h2:])
        n_b = jnp.tanh(gi_b[:, h2:] + rz_b[:, :hid] * gh_b[:, h2:])
        z_f = rz_f[:, hid:]
        z_b = rz_b[:, hid:]
        h_f = (1.0 - z_f) * n_f + z_f * h_f
        h_b = (1.0 - z_b) * n_b + z_b * h_b
        encf_ref[t * batch:(t + 1) * batch, :] = h_f                # enc_fwd at time t
        encb_ref[tb * batch:(tb + 1) * batch, :] = h_b              # enc_bwd at time tb

    hidden_ref[0] = h_f                                             # forward final state
    hidden_ref[1] = h_b                                             # backward final state (= hidden[-1])

    # ---- (3) fully batched additive attention ----
    # score_t = v . tanh(W_a [h_last ; enc_fwd_t ; enc_bwd_t] + b_a)
    sel = sel_ref[...]                                              # (T*B, B)  row t*B+b one-hot at b
    selT = selT_ref[...]                                            # (B, T*B)
    toh = toh_ref[...]                                              # (T*B, T)  row t*B+b one-hot at t

    enc_cat = jnp.concatenate([encf_ref[...], encb_ref[...]], axis=1)        # (T*B, 2H)

    part_h = jnp.dot(h_b, wah_ref[...], preferred_element_type=jnp.float32) + ba_ref[...]   # (B, H)
    part_h_all = jnp.dot(sel, part_h, preferred_element_type=jnp.float32)                   # (T*B, H)
    enc_proj = jnp.dot(enc_cat, wae_ref[...], preferred_element_type=jnp.float32)           # (T*B, H)
    energy = jnp.tanh(enc_proj + part_h_all)                                                # (T*B, H)

    v_all = jnp.broadcast_to(v_ref[...], energy.shape)
    scores_flat = jnp.sum(energy * v_all, axis=1, keepdims=True)             # (T*B, 1)
    # reorder (T*B,1) -> (B,T) with one selector matmul (rides the MXU)
    scores = jnp.dot(selT, toh * scores_flat, preferred_element_type=jnp.float32)  # (B, T)

    # softmax over the time axis (dim=1 in the PyTorch code)
    m = jnp.max(scores, axis=1, keepdims=True)
    e = jnp.exp(scores - m)
    attn = e * pl.reciprocal(jnp.sum(e, axis=1, keepdims=True), approx=True)
    attnw_ref[...] = attn[:, None, :]                                        # (B, 1, T)

    # ---- (4) context = attn @ encoder_outputs, fused fc, log_softmax ----
    attn_rows = jnp.dot(sel, attn, preferred_element_type=jnp.float32)       # (T*B, T): row i = attn[b_i,:]
    attn_flat = jnp.sum(attn_rows * toh, axis=1, keepdims=True)              # (T*B, 1): attn[b_i, t_i]
    ctx = jnp.dot(selT, attn_flat * enc_cat, preferred_element_type=jnp.float32)   # (B, 2H)

    logits = jnp.dot(ctx, fcw_ref[...], preferred_element_type=jnp.float32) + fcb_ref[...]
    lm = jnp.max(logits, axis=1, keepdims=True)
    lse = jnp.log(jnp.sum(jnp.exp(logits - lm), axis=1, keepdims=True)) + lm
    out_ref[...] = logits - lse


def init_params(key):
    ks = jax.random.split(key, 14)
    stdv = 1.0 / math.sqrt(H)

    def uni(k, shape, bound):
        return jax.random.uniform(k, shape, jnp.float32, -bound, bound)

    emb_table = jax.random.normal(ks[0], (V, H), jnp.float32)          # nn.Embedding default N(0,1)
    # GRU params (PyTorch layout: (3H, H) / (3H,), gate order r,z,n), per direction
    wih_f = uni(ks[1], (3 * H, H), stdv); whh_f = uni(ks[2], (3 * H, H), stdv)
    bih_f = uni(ks[3], (3 * H,), stdv);   bhh_f = uni(ks[4], (3 * H,), stdv)
    wih_b = uni(ks[5], (3 * H, H), stdv); whh_b = uni(ks[6], (3 * H, H), stdv)
    bih_b = uni(ks[7], (3 * H,), stdv);   bhh_b = uni(ks[8], (3 * H,), stdv)
    # TODO(synk): the original module declares attn = nn.Linear(hidden_size*2, hidden_size) but
    # feeds it a 3*hidden concat [hidden ; fwd_enc ; bwd_enc]; we use input dim 3H so the forward
    # is well-defined (the PyTorch code as written would raise a shape error).
    a_bound = 1.0 / math.sqrt(3 * H)
    wa = uni(ks[9], (H, 3 * H), a_bound)
    ba = uni(ks[10], (H,), a_bound)
    v = stdv * jax.random.normal(ks[11], (H,), jnp.float32)            # v.data.normal_(0, 1/sqrt(H))
    f_bound = 1.0 / math.sqrt(2 * H)
    fcw = uni(ks[12], (O, 2 * H), f_bound)
    fcb = uni(ks[13], (O,), f_bound)
    return dict(emb_table=emb_table,
                wih_f=wih_f, whh_f=whh_f, bih_f=bih_f, bhh_f=bhh_f,
                wih_b=wih_b, whh_b=whh_b, bih_b=bih_b, bhh_b=bhh_b,
                wa=wa, ba=ba, v=v, fcw=fcw, fcb=fcb)


def bigru_attention_forward(input_seq, params):
    # embedding lookup (integer gather) is glue, done in plain JAX
    emb = params["emb_table"][input_seq].astype(jnp.float32)           # (T, B, H)
    emb2d = emb.reshape(T * B, H)                                      # row t*B + b
    # layout-plumbing selectors built host-side (tiny constants, one DMA each):
    sel = jnp.tile(jnp.eye(B, dtype=jnp.float32), (T, 1))              # (T*B, B): row t*B+b one-hot at b
    selT = sel.T                                                       # (B, T*B)
    toh = jnp.repeat(jnp.eye(T, dtype=jnp.float32), B, axis=0)         # (T*B, T): row t*B+b one-hot at t

    args = (
        emb2d, sel, selT, toh,
        params["wih_f"].T, params["bih_f"][None, :],
        params["whh_f"].T, params["bhh_f"][None, :],
        params["wih_b"].T, params["bih_b"][None, :],
        params["whh_b"].T, params["bhh_b"][None, :],
        params["wa"][:, :H].T,            # hidden part of attn weight          (H, H)
        params["wa"][:, H:].T,            # fused fwd+bwd encoder part          (2H, H)
        params["ba"][None, :],
        params["v"][None, :],
        params["fcw"].T,                  # fused fc weight (2H, O)
        params["fcb"][None, :],
    )
    out_shapes = (
        jax.ShapeDtypeStruct((B, O), jnp.float32),
        jax.ShapeDtypeStruct((2, B, H), jnp.float32),
        jax.ShapeDtypeStruct((B, 1, T), jnp.float32),
    )
    vmem = pl.BlockSpec(memory_space=pltpu.MemorySpace.VMEM)
    return pl.pallas_call(
        bigru_attention_kernel,
        out_shape=out_shapes,
        in_specs=[vmem] * len(args),
        out_specs=(vmem, vmem, vmem),
        scratch_shapes=[
            pltpu.VMEM((T * B, 3 * H), jnp.float32),   # fwd input-to-hidden gates
            pltpu.VMEM((T * B, 3 * H), jnp.float32),   # bwd input-to-hidden gates
            pltpu.VMEM((T * B, H), jnp.float32),       # fwd encoder outputs
            pltpu.VMEM((T * B, H), jnp.float32),       # bwd encoder outputs
        ],
    )(*args)


def reference_forward(input_seq, params):
    """Pure-JAX mirror of the PyTorch forward for a correctness check."""
    emb = params["emb_table"][input_seq].astype(jnp.float32)

    def cell(x, h, wih, whh, bih, bhh):
        gi = x @ wih.T + bih
        gh = h @ whh.T + bhh
        i_r, i_z, i_n = gi[:, :H], gi[:, H:2 * H], gi[:, 2 * H:]
        h_r, h_z, h_n = gh[:, :H], gh[:, H:2 * H], gh[:, 2 * H:]
        r = jax.nn.sigmoid(i_r + h_r)
        z = jax.nn.sigmoid(i_z + h_z)
        n = jnp.tanh(i_n + r * h_n)
        return (1.0 - z) * n + z * h

    h_f = jnp.zeros((B, H), jnp.float32)
    enc_f = []
    for t in range(T):
        h_f = cell(emb[t], h_f, params["wih_f"], params["whh_f"], params["bih_f"], params["bhh_f"])
        enc_f.append(h_f)
    h_b = jnp.zeros((B, H), jnp.float32)
    enc_b = [None] * T
    for i in range(T):
        t = T - 1 - i
        h_b = cell(emb[t], h_b, params["wih_b"], params["whh_b"], params["bih_b"], params["bhh_b"])
        enc_b[t] = h_b

    enc = jnp.stack([jnp.concatenate([enc_f[t], enc_b[t]], -1) for t in range(T)], 0)  # (T,B,2H)
    hidden = jnp.stack([h_f, h_b], axis=0)                                             # (2,B,H)

    h_last = h_b                                             # hidden[-1]
    enc_bt = jnp.transpose(enc, (1, 0, 2))                   # (B,T,2H)
    h_rep = jnp.broadcast_to(h_last[:, None, :], (B, T, H))  # (B,T,H)
    cat = jnp.concatenate([h_rep, enc_bt], axis=2)           # (B,T,3H)
    energy = jnp.tanh(jnp.einsum('bti,oi->bto', cat, params["wa"]) + params["ba"])
    scores = jnp.einsum('bto,o->bt', energy, params["v"])
    attn = jax.nn.softmax(scores, axis=1)
    attn_w = attn[:, None, :]
    context = jnp.einsum('bt,bte->be', attn, enc_bt)
    logits = context @ params["fcw"].T + params["fcb"]
    output = jax.nn.log_softmax(logits, axis=1)
    return output, hidden, attn_w


if __name__ == "__main__":
    key = jax.random.PRNGKey(0)
    pkey, ikey = jax.random.split(key)
    params = init_params(pkey)
    input_seq = jax.random.randint(ikey, (T, B), 0, V, dtype=jnp.int32)

    out, hidden, attn_w = bigru_attention_forward(input_seq, params)
    jax.block_until_ready((out, hidden, attn_w))

    ref_out, ref_hidden, ref_attn = reference_forward(input_seq, params)
    np.testing.assert_allclose(np.asarray(out), np.asarray(ref_out), atol=2e-2, rtol=2e-2)
    np.testing.assert_allclose(np.asarray(hidden), np.asarray(ref_hidden), atol=2e-2, rtol=2e-2)
    np.testing.assert_allclose(np.asarray(attn_w), np.asarray(ref_attn), atol=2e-2, rtol=2e-2)

    print("KERNEL_OK")
</pallas_src>

<mosaic_0001>
module attributes {stable_mosaic.version = 11 : i64} {
  func.func @bigru_attention_kernel(%arg0: memref<16x32xf32, #tpu.memory_space<vmem>>, %arg1: memref<16x2xf32, #tpu.memory_space<vmem>>, %arg2: memref<2x16xf32, #tpu.memory_space<vmem>>, %arg3: memref<16x8xf32, #tpu.memory_space<vmem>>, %arg4: memref<32x96xf32, #tpu.memory_space<vmem>>, %arg5: memref<1x96xf32, #tpu.memory_space<vmem>>, %arg6: memref<32x96xf32, #tpu.memory_space<vmem>>, %arg7: memref<1x96xf32, #tpu.memory_space<vmem>>, %arg8: memref<32x96xf32, #tpu.memory_space<vmem>>, %arg9: memref<1x96xf32, #tpu.memory_space<vmem>>, %arg10: memref<32x96xf32, #tpu.memory_space<vmem>>, %arg11: memref<1x96xf32, #tpu.memory_space<vmem>>, %arg12: memref<32x32xf32, #tpu.memory_space<vmem>>, %arg13: memref<64x32xf32, #tpu.memory_space<vmem>>, %arg14: memref<1x32xf32, #tpu.memory_space<vmem>>, %arg15: memref<1x32xf32, #tpu.memory_space<vmem>>, %arg16: memref<64x5xf32, #tpu.memory_space<vmem>>, %arg17: memref<1x5xf32, #tpu.memory_space<vmem>>, %arg18: memref<2x5xf32, #tpu.memory_space<vmem>>, %arg19: memref<2x2x32xf32, #tpu.memory_space<vmem>>, %arg20: memref<2x1x8xf32, #tpu.memory_space<vmem>>, %arg21: memref<16x96xf32, #tpu.memory_space<vmem>>, %arg22: memref<16x96xf32, #tpu.memory_space<vmem>>, %arg23: memref<16x32xf32, #tpu.memory_space<vmem>>, %arg24: memref<16x32xf32, #tpu.memory_space<vmem>>) attributes {dimension_semantics = [], scalar_prefetch = 0 : i64, scratch_operands = 4 : i64, tpu.core_type = #tpu.core_type<tc>} {
    %c0 = arith.constant 0 : index
    %c0_0 = arith.constant 0 : index
    %0 = vector.load %arg0[%c0, %c0_0] : memref<16x32xf32, #tpu.memory_space<vmem>>, vector<16x32xf32>
    %c0_1 = arith.constant 0 : index
    %c0_2 = arith.constant 0 : index
    %1 = vector.load %arg4[%c0_1, %c0_2] : memref<32x96xf32, #tpu.memory_space<vmem>>, vector<32x96xf32>
    %cst = arith.constant dense<0.000000e+00> : vector<16x96xf32>
    %2 = tpu.matmul %0, %1, %cst {dimension_numbers = #tpu.dot_dimension_numbers<[1], [0], [0], [1], [0, 0, 1, 1], [], []>} : vector<16x32xf32>, vector<32x96xf32>, vector<16x96xf32> -> vector<16x96xf32>
    %c0_3 = arith.constant 0 : index
    %c0_4 = arith.constant 0 : index
    %3 = vector.load %arg5[%c0_3, %c0_4] : memref<1x96xf32, #tpu.memory_space<vmem>>, vector<1x96xf32>
    %4 = vector.broadcast %3 : vector<1x96xf32> to vector<16x96xf32>
    %5 = arith.addf %2, %4 : vector<16x96xf32>
    %c0_5 = arith.constant 0 : index
    %c0_6 = arith.constant 0 : index
    %6 = vector.load %arg21[%c0_5, %c0_6] : memref<16x96xf32, #tpu.memory_space<vmem>>, vector<16x96xf32>
    tpu.vector_store %arg21[%c0_5, %c0_6], %5 {strides = array<i32>} : memref<16x96xf32, #tpu.memory_space<vmem>>, vector<16x96xf32>,
    %c0_7 = arith.constant 0 : index
    %c0_8 = arith.constant 0 : index
    %7 = vector.load %arg8[%c0_7, %c0_8] : memref<32x96xf32, #tpu.memory_space<vmem>>, vector<32x96xf32>
    %cst_9 = arith.constant dense<0.000000e+00> : vector<16x96xf32>
    %8 = tpu.matmul %0, %7, %cst_9 {dimension_numbers = #tpu.dot_dimension_numbers<[1], [0], [0], [1], [0, 0, 1, 1], [], []>} : vector<16x32xf32>, vector<32x96xf32>, vector<16x96xf32> -> vector<16x96xf32>
    %c0_10 = arith.constant 0 : index
    %c0_11 = arith.constant 0 : index
    %9 = vector.load %arg9[%c0_10, %c0_11] : memref<1x96xf32, #tpu.memory_space<vmem>>, vector<1x96xf32>
    %10 = vector.broadcast %9 : vector<1x96xf32> to vector<16x96xf32>
    %11 = arith.addf %8, %10 : vector<16x96xf32>
    %c0_12 = arith.constant 0 : index
    %c0_13 = arith.constant 0 : index
    %12 = vector.load %arg22[%c0_12, %c0_13] : memref<16x96xf32, #tpu.memory_space<vmem>>, vector<16x96xf32>
    tpu.vector_store %arg22[%c0_12, %c0_13], %11 {strides = array<i32>} : memref<16x96xf32, #tpu.memory_space<vmem>>, vector<16x96xf32>,
    %c0_14 = arith.constant 0 : index
    %c0_15 = arith.constant 0 : index
    %13 = vector.load %arg6[%c0_14, %c0_15] : memref<32x96xf32, #tpu.memory_space<vmem>>, vector<32x96xf32>
    %c0_16 = arith.constant 0 : index
    %c0_17 = arith.constant 0 : index
    %14 = vector.load %arg10[%c0_16, %c0_17] : memref<32x96xf32, #tpu.memory_space<vmem>>, vector<32x96xf32>
    %c0_18 = arith.constant 0 : index
    %c0_19 = arith.constant 0 : index
    %15 = vector.load %arg7[%c0_18, %c0_19] : memref<1x96xf32, #tpu.memory_space<vmem>>, vector<1x96xf32>
    %16 = vector.shape_cast %15 : vector<1x96xf32> to vector<1x96xf32>
    %17 = vector.broadcast %16 : vector<1x96xf32> to vector<2x96xf32>
    %c0_20 = arith.constant 0 : index
    %c0_21 = arith.constant 0 : index
    %18 = vector.load %arg11[%c0_20, %c0_21] : memref<1x96xf32, #tpu.memory_space<vmem>>, vector<1x96xf32>
    %19 = vector.shape_cast %18 : vector<1x96xf32> to vector<1x96xf32>
    %20 = vector.broadcast %19 : vector<1x96xf32> to vector<2x96xf32>
    %cst_22 = arith.constant 0.000000e+00 : f32
    %21 = vector.broadcast %cst_22 : f32 to vector<2x32xf32>
    %cst_23 = arith.constant 0.000000e+00 : f32
    %22 = vector.broadcast %cst_23 : f32 to vector<2x32xf32>
    %c0_24 = arith.constant 0 : index
    %c0_25 = arith.constant 0 : index
    %23 = vector.load %arg21[%c0_24, %c0_25] : memref<16x96xf32, #tpu.memory_space<vmem>>, vector<2x96xf32>
    %c14 = arith.constant 14 : index
    %c0_26 = arith.constant 0 : index
    %24 = vector.load %arg22[%c14, %c0_26] : memref<16x96xf32, #tpu.memory_space<vmem>>, vector<2x96xf32>
    %cst_27 = arith.constant dense<0.000000e+00> : vector<2x96xf32>
    %25 = tpu.matmul %21, %13, %cst_27 {dimension_numbers = #tpu.dot_dimension_numbers<[1], [0], [0], [1], [0, 0, 1, 1], [], []>} : vector<2x32xf32>, vector<32x96xf32>, vector<2x96xf32> -> vector<2x96xf32>
    %26 = arith.addf %25, %17 : vector<2x96xf32>
    %cst_28 = arith.constant dense<0.000000e+00> : vector<2x96xf32>
    %27 = tpu.matmul %22, %14, %cst_28 {dimension_numbers = #tpu.dot_dimension_numbers<[1], [0], [0], [1], [0, 0, 1, 1], [], []>} : vector<2x32xf32>, vector<32x96xf32>, vector<2x96xf32> -> vector<2x96xf32>
    %28 = arith.addf %27, %20 : vector<2x96xf32>
    %29 = vector.extract_strided_slice %23 {offsets = [0, 0], sizes = [2, 64], strides = [1, 1]} : vector<2x96xf32> to vector<2x64xf32>
    %30 = vector.extract_strided_slice %26 {offsets = [0, 0], sizes = [2, 64], strides = [1, 1]} : vector<2x96xf32> to vector<2x64xf32>
    %31 = arith.addf %29, %30 : vector<2x64xf32>
    %32 = arith.negf %31 : vector<2x64xf32>
    %33 = math.exp %32 : vector<2x64xf32>
    %cst_29 = arith.constant 1.000000e+00 : f32
    %34 = vector.broadcast %cst_29 : f32 to vector<2x64xf32>
    %35 = arith.addf %34, %33 : vector<2x64xf32>
    %36 = arith.divf %34, %35 : vector<2x64xf32>
    %37 = vector.extract_strided_slice %24 {offsets = [0, 0], sizes = [2, 64], strides = [1, 1]} : vector<2x96xf32> to vector<2x64xf32>
    %38 = vector.extract_strided_slice %28 {offsets = [0, 0], sizes = [2, 64], strides = [1, 1]} : vector<2x96xf32> to vector<2x64xf32>
    %39 = arith.addf %37, %38 : vector<2x64xf32>
    %40 = arith.negf %39 : vector<2x64xf32>
    %41 = math.exp %40 : vector<2x64xf32>
    %cst_30 = arith.constant 1.000000e+00 : f32
    %42 = vector.broadcast %cst_30 : f32 to vector<2x64xf32>
    %43 = arith.addf %42, %41 : vector<2x64xf32>
    %44 = arith.divf %42, %43 : vector<2x64xf32>
    %45 = vector.extract_strided_slice %23 {offsets = [0, 64], sizes = [2, 32], strides = [1, 1]} : vector<2x96xf32> to vector<2x32xf32>
    %46 = vector.extract_strided_slice %36 {offsets = [0, 0], sizes = [2, 32], strides = [1, 1]} : vector<2x64xf32> to vector<2x32xf32>
    %47 = vector.extract_strided_slice %26 {offsets = [0, 64], sizes = [2, 32], strides = [1, 1]} : vector<2x96xf32> to vector<2x32xf32>
    %48 = arith.mulf %46, %47 : vector<2x32xf32>
    %49 = arith.addf %45, %48 : vector<2x32xf32>
    %50 = math.tanh %49 : vector<2x32xf32>
    %51 = vector.extract_strided_slice %24 {offsets = [0, 64], sizes = [2, 32], strides = [1, 1]} : vector<2x96xf32> to vector<2x32xf32>
    %52 = vector.extract_strided_slice %44 {offsets = [0, 0], sizes = [2, 32], strides = [1, 1]} : vector<2x64xf32> to vector<2x32xf32>
    %53 = vector.extract_strided_slice %28 {offsets = [0, 64], sizes = [2, 32], strides = [1, 1]} : vector<2x96xf32> to vector<2x32xf32>
    %54 = arith.mulf %52, %53 : vector<2x32xf32>
    %55 = arith.addf %51, %54 : vector<2x32xf32>
    %56 = math.tanh %55 : vector<2x32xf32>
    %57 = vector.extract_strided_slice %36 {offsets = [0, 32], sizes = [2, 32], strides = [1, 1]} : vector<2x64xf32> to vector<2x32xf32>
    %58 = vector.extract_strided_slice %44 {offsets = [0, 32], sizes = [2, 32], strides = [1, 1]} : vector<2x64xf32> to vector<2x32xf32>
    %cst_31 = arith.constant 1.000000e+00 : f32
    %59 = vector.broadcast %cst_31 : f32 to vector<2x32xf32>
    %60 = arith.subf %59, %57 : vector<2x32xf32>
    %61 = arith.mulf %60, %50 : vector<2x32xf32>
    %62 = arith.mulf %57, %21 : vector<2x32xf32>
    %63 = arith.addf %61, %62 : vector<2x32xf32>
    %cst_32 = arith.constant 1.000000e+00 : f32
    %64 = vector.broadcast %cst_32 : f32 to vector<2x32xf32>
    %65 = arith.subf %64, %58 : vector<2x32xf32>
    %66 = arith.mulf %65, %56 : vector<2x32xf32>
    %67 = arith.mulf %58, %22 : vector<2x32xf32>
    %68 = arith.addf %66, %67 : vector<2x32xf32>
    %c0_33 = arith.constant 0 : index
    %c0_34 = arith.constant 0 : index
    %69 = vector.load %arg23[%c0_33, %c0_34] : memref<16x32xf32, #tpu.memory_space<vmem>>, vector<2x32xf32>
    tpu.vector_store %arg23[%c0_33, %c0_34], %63 {strides = array<i32>} : memref<16x32xf32, #tpu.memory_space<vmem>>, vector<2x32xf32>,
    %c14_35 = arith.constant 14 : index
    %c0_36 = arith.constant 0 : index
    %70 = vector.load %arg24[%c14_35, %c0_36] : memref<16x32xf32, #tpu.memory_space<vmem>>, vector<2x32xf32>
    tpu.vector_store %arg24[%c14_35, %c0_36], %68 {strides = array<i32>} : memref<16x32xf32, #tpu.memory_space<vmem>>, vector<2x32xf32>,
    %c2 = arith.constant 2 : index
    %c0_37 = arith.constant 0 : index
    %71 = vector.load %arg21[%c2, %c0_37] : memref<16x96xf32, #tpu.memory_space<vmem>>, vector<2x96xf32>
    %c12 = arith.constant 12 : index
    %c0_38 = arith.constant 0 : index
    %72 = vector.load %arg22[%c12, %c0_38] : memref<16x96xf32, #tpu.memory_space<vmem>>, vector<2x96xf32>
    %cst_39 = arith.constant dense<0.000000e+00> : vector<2x96xf32>
    %73 = tpu.matmul %63, %13, %cst_39 {dimension_numbers = #tpu.dot_dimension_numbers<[1], [0], [0], [1], [0, 0, 1, 1], [], []>} : vector<2x32xf32>, vector<32x96xf32>, vector<2x96xf32> -> vector<2x96xf32>
    %74 = arith.addf %73, %17 : vector<2x96xf32>
    %cst_40 = arith.constant dense<0.000000e+00> : vector<2x96xf32>
    %75 = tpu.matmul %68, %14, %cst_40 {dimension_numbers = #tpu.dot_dimension_numbers<[1], [0], [0], [1], [0, 0, 1, 1], [], []>} : vector<2x32xf32>, vector<32x96xf32>, vector<2x96xf32> -> vector<2x96xf32>
    %76 = arith.addf %75, %20 : vector<2x96xf32>
    %77 = vector.extract_strided_slice %71 {offsets = [0, 0], sizes = [2, 64], strides = [1, 1]} : vector<2x96xf32> to vector<2x64xf32>
    %78 = vector.extract_strided_slice %74 {offsets = [0, 0], sizes = [2, 64], strides = [1, 1]} : vector<2x96xf32> to vector<2x64xf32>
    %79 = arith.addf %77, %78 : vector<2x64xf32>
    %80 = arith.negf %79 : vector<2x64xf32>
    %81 = math.exp %80 : vector<2x64xf32>
    %cst_41 = arith.constant 1.000000e+00 : f32
    %82 = vector.broadcast %cst_41 : f32 to vector<2x64xf32>
    %83 = arith.addf %82, %81 : vector<2x64xf32>
    %84 = arith.divf %82, %83 : vector<2x64xf32>
    %85 = vector.extract_strided_slice %72 {offsets = [0, 0], sizes = [2, 64], strides = [1, 1]} : vector<2x96xf32> to vector<2x64xf32>
    %86 = vector.extract_strided_slice %76 {offsets = [0, 0], sizes = [2, 64], strides = [1, 1]} : vector<2x96xf32> to vector<2x64xf32>
    %87 = arith.addf %85, %86 : vector<2x64xf32>
    %88 = arith.negf %87 : vector<2x64xf32>
    %89 = math.exp %88 : vector<2x64xf32>
    %cst_42 = arith.constant 1.000000e+00 : f32
    %90 = vector.broadcast %cst_42 : f32 to vector<2x64xf32>
    %91 = arith.addf %90, %89 : vector<2x64xf32>
    %92 = arith.divf %90, %91 : vector<2x64xf32>
    %93 = vector.extract_strided_slice %71 {offsets = [0, 64], sizes = [2, 32], strides = [1, 1]} : vector<2x96xf32> to vector<2x32xf32>
    %94 = vector.extract_strided_slice %84 {offsets = [0, 0], sizes = [2, 32], strides = [1, 1]} : vector<2x64xf32> to vector<2x32xf32>
    %95 = vector.extract_strided_slice %74 {offsets = [0, 64], sizes = [2, 32], strides = [1, 1]} : vector<2x96xf32> to vector<2x32xf32>
    %96 = arith.mulf %94, %95 : vector<2x32xf32>
    %97 = arith.addf %93, %96 : vector<2x32xf32>
    %98 = math.tanh %97 : vector<2x32xf32>
    %99 = vector.extract_strided_slice %72 {offsets = [0, 64], sizes = [2, 32], strides = [1, 1]} : vector<2x96xf32> to vector<2x32xf32>
    %100 = vector.extract_strided_slice %92 {offsets = [0, 0], sizes = [2, 32], strides = [1, 1]} : vector<2x64xf32> to vector<2x32xf32>
    %101 = vector.extract_strided_slice %76 {offsets = [0, 64], sizes = [2, 32], strides = [1, 1]} : vector<2x96xf32> to vector<2x32xf32>
    %102 = arith.mulf %100, %101 : vector<2x32xf32>
    %103 = arith.addf %99, %102 : vector<2x32xf32>
    %104 = math.tanh %103 : vector<2x32xf32>
    %105 = vector.extract_strided_slice %84 {offsets = [0, 32], sizes = [2, 32], strides = [1, 1]} : vector<2x64xf32> to vector<2x32xf32>
    %106 = vector.extract_strided_slice %92 {offsets = [0, 32], sizes = [2, 32], strides = [1, 1]} : vector<2x64xf32> to vector<2x32xf32>
    %cst_43 = arith.constant 1.000000e+00 : f32
    %107 = vector.broadcast %cst_43 : f32 to vector<2x32xf32>
    %108 = arith.subf %107, %105 : vector<2x32xf32>
    %109 = arith.mulf %108, %98 : vector<2x32xf32>
    %110 = arith.mulf %105, %63 : vector<2x32xf32>
    %111 = arith.addf %109, %110 : vector<2x32xf32>
    %cst_44 = arith.constant 1.000000e+00 : f32
    %112 = vector.broadcast %cst_44 : f32 to vector<2x32xf32>
    %113 = arith.subf %112, %106 : vector<2x32xf32>
    %114 = arith.mulf %113, %104 : vector<2x32xf32>
    %115 = arith.mulf %106, %68 : vector<2x32xf32>
    %116 = arith.addf %114, %115 : vector<2x32xf32>
    %c2_45 = arith.constant 2 : index
    %c0_46 = arith.constant 0 : index
    %117 = vector.load %arg23[%c2_45, %c0_46] : memref<16x32xf32, #tpu.memory_space<vmem>>, vector<2x32xf32>
    tpu.vector_store %arg23[%c2_45, %c0_46], %111 {strides = array<i32>} : memref<16x32xf32, #tpu.memory_space<vmem>>, vector<2x32xf32>,
    %c12_47 = arith.constant 12 : index
    %c0_48 = arith.constant 0 : index
    %118 = vector.load %arg24[%c12_47, %c0_48] : memref<16x32xf32, #tpu.memory_space<vmem>>, vector<2x32xf32>
    tpu.vector_store %arg24[%c12_47, %c0_48], %116 {strides = array<i32>} : memref<16x32xf32, #tpu.memory_space<vmem>>, vector<2x32xf32>,
    %c4 = arith.constant 4 : index
    %c0_49 = arith.constant 0 : index
    %119 = vector.load %arg21[%c4, %c0_49] : memref<16x96xf32, #tpu.memory_space<vmem>>, vector<2x96xf32>
    %c10 = arith.constant 10 : index
    %c0_50 = arith.constant 0 : index
    %120 = vector.load %arg22[%c10, %c0_50] : memref<16x96xf32, #tpu.memory_space<vmem>>, vector<2x96xf32>
    %cst_51 = arith.constant dense<0.000000e+00> : vector<2x96xf32>
    %121 = tpu.matmul %111, %13, %cst_51 {dimension_numbers = #tpu.dot_dimension_numbers<[1], [0], [0], [1], [0, 0, 1, 1], [], []>} : vector<2x32xf32>, vector<32x96xf32>, vector<2x96xf32> -> vector<2x96xf32>
    %122 = arith.addf %121, %17 : vector<2x96xf32>
    %cst_52 = arith.constant dense<0.000000e+00> : vector<2x96xf32>
    %123 = tpu.matmul %116, %14, %cst_52 {dimension_numbers = #tpu.dot_dimension_numbers<[1], [0], [0], [1], [0, 0, 1, 1], [], []>} : vector<2x32xf32>, vector<32x96xf32>, vector<2x96xf32> -> vector<2x96xf32>
    %124 = arith.addf %123, %20 : vector<2x96xf32>
    %125 = vector.extract_strided_slice %119 {offsets = [0, 0], sizes = [2, 64], strides = [1, 1]} : vector<2x96xf32> to vector<2x64xf32>
    %126 = vector.extract_strided_slice %122 {offsets = [0, 0], sizes = [2, 64], strides = [1, 1]} : vector<2x96xf32> to vector<2x64xf32>
    %127 = arith.addf %125, %126 : vector<2x64xf32>
    %128 = arith.negf %127 : vector<2x64xf32>
    %129 = math.exp %128 : vector<2x64xf32>
    %cst_53 = arith.constant 1.000000e+00 : f32
    %130 = vector.broadcast %cst_53 : f32 to vector<2x64xf32>
    %131 = arith.addf %130, %129 : vector<2x64xf32>
    %132 = arith.divf %130, %131 : vector<2x64xf32>
    %133 = vector.extract_strided_slice %120 {offsets = [0, 0], sizes = [2, 64], strides = [1, 1]} : vector<2x96xf32> to vector<2x64xf32>
    %134 = vector.extract_strided_slice %124 {offsets = [0, 0], sizes = [2, 64], strides = [1, 1]} : vector<2x96xf32> to vector<2x64xf32>
    %135 = arith.addf %133, %134 : vector<2x64xf32>
    %136 = arith.negf %135 : vector<2x64xf32>
    %137 = math.exp %136 : vector<2x64xf32>
    %cst_54 = arith.constant 1.000000e+00 : f32
    %138 = vector.broadcast %cst_54 : f32 to vector<2x64xf32>
    %139 = arith.addf %138, %137 : vector<2x64xf32>
    %140 = arith.divf %138, %139 : vector<2x64xf32>
    %141 = vector.extract_strided_slice %119 {offsets = [0, 64], sizes = [2, 32], strides = [1, 1]} : vector<2x96xf32> to vector<2x32xf32>
    %142 = vector.extract_strided_slice %132 {offsets = [0, 0], sizes = [2, 32], strides = [1, 1]} : vector<2x64xf32> to vector<2x32xf32>
    %143 = vector.extract_strided_slice %122 {offsets = [0, 64], sizes = [2, 32], strides = [1, 1]} : vector<2x96xf32> to vector<2x32xf32>
    %144 = arith.mulf %142, %143 : vector<2x32xf32>
    %145 = arith.addf %141, %144 : vector<2x32xf32>
    %146 = math.tanh %145 : vector<2x32xf32>
    %147 = vector.extract_strided_slice %120 {offsets = [0, 64], sizes = [2, 32], strides = [1, 1]} : vector<2x96xf32> to vector<2x32xf32>
    %148 = vector.extract_strided_slice %140 {offsets = [0, 0], sizes = [2, 32], strides = [1, 1]} : vector<2x64xf32> to vector<2x32xf32>
    %149 = vector.extract_strided_slice %124 {offsets = [0, 64], sizes = [2, 32], strides = [1, 1]} : vector<2x96xf32> to vector<2x32xf32>
    %150 = arith.mulf %148, %149 : vector<2x32xf32>
    %151 = arith.addf %147, %150 : vector<2x32xf32>
    %152 = math.tanh %151 : vector<2x32xf32>
    %153 = vector.extract_strided_slice %132 {offsets = [0, 32], sizes = [2, 32], strides = [1, 1]} : vector<2x64xf32> to vector<2x32xf32>
    %154 = vector.extract_strided_slice %140 {offsets = [0, 32], sizes = [2, 32], strides = [1, 1]} : vector<2x64xf32> to vector<2x32xf32>
    %cst_55 = arith.constant 1.000000e+00 : f32
    %155 = vector.broadcast %cst_55 : f32 to vector<2x32xf32>
    %156 = arith.subf %155, %153 : vector<2x32xf32>
    %157 = arith.mulf %156, %146 : vector<2x32xf32>
    %158 = arith.mulf %153, %111 : vector<2x32xf32>
    %159 = arith.addf %157, %158 : vector<2x32xf32>
    %cst_56 = arith.constant 1.000000e+00 : f32
    %160 = vector.broadcast %cst_56 : f32 to vector<2x32xf32>
    %161 = arith.subf %160, %154 : vector<2x32xf32>
    %162 = arith.mulf %161, %152 : vector<2x32xf32>
    %163 = arith.mulf %154, %116 : vector<2x32xf32>
    %164 = arith.addf %162, %163 : vector<2x32xf32>
    %c4_57 = arith.constant 4 : index
    %c0_58 = arith.constant 0 : index
    %165 = vector.load %arg23[%c4_57, %c0_58] : memref<16x32xf32, #tpu.memory_space<vmem>>, vector<2x32xf32>
    tpu.vector_store %arg23[%c4_57, %c0_58], %159 {strides = array<i32>} : memref<16x32xf32, #tpu.memory_space<vmem>>, vector<2x32xf32>,
    %c10_59 = arith.constant 10 : index
    %c0_60 = arith.constant 0 : index
    %166 = vector.load %arg24[%c10_59, %c0_60] : memref<16x32xf32, #tpu.memory_space<vmem>>, vector<2x32xf32>
    tpu.vector_store %arg24[%c10_59, %c0_60], %164 {strides = array<i32>} : memref<16x32xf32, #tpu.memory_space<vmem>>, vector<2x32xf32>,
    %c6 = arith.constant 6 : index
    %c0_61 = arith.constant 0 : index
    %167 = vector.load %arg21[%c6, %c0_61] : memref<16x96xf32, #tpu.memory_space<vmem>>, vector<2x96xf32>
    %c8 = arith.constant 8 : index
    %c0_62 = arith.constant 0 : index
    %168 = vector.load %arg22[%c8, %c0_62] : memref<16x96xf32, #tpu.memory_space<vmem>>, vector<2x96xf32>
    %cst_63 = arith.constant dense<0.000000e+00> : vector<2x96xf32>
    %169 = tpu.matmul %159, %13, %cst_63 {dimension_numbers = #tpu.dot_dimension_numbers<[1], [0], [0], [1], [0, 0, 1, 1], [], []>} : vector<2x32xf32>, vector<32x96xf32>, vector<2x96xf32> -> vector<2x96xf32>
    %170 = arith.addf %169, %17 : vector<2x96xf32>
    %cst_64 = arith.constant dense<0.000000e+00> : vector<2x96xf32>
    %171 = tpu.matmul %164, %14, %cst_64 {dimension_numbers = #tpu.dot_dimension_numbers<[1], [0], [0], [1], [0, 0, 1, 1], [], []>} : vector<2x32xf32>, vector<32x96xf32>, vector<2x96xf32> -> vector<2x96xf32>
    %172 = arith.addf %171, %20 : vector<2x96xf32>
    %173 = vector.extract_strided_slice %167 {offsets = [0, 0], sizes = [2, 64], strides = [1, 1]} : vector<2x96xf32> to vector<2x64xf32>
    %174 = vector.extract_strided_slice %170 {offsets = [0, 0], sizes = [2, 64], strides = [1, 1]} : vector<2x96xf32> to vector<2x64xf32>
    %175 = arith.addf %173, %174 : vector<2x64xf32>
    %176 = arith.negf %175 : vector<2x64xf32>
    %177 = math.exp %176 : vector<2x64xf32>
    %cst_65 = arith.constant 1.000000e+00 : f32
    %178 = vector.broadcast %cst_65 : f32 to vector<2x64xf32>
    %179 = arith.addf %178, %177 : vector<2x64xf32>
    %180 = arith.divf %178, %179 : vector<2x64xf32>
    %181 = vector.extract_strided_slice %168 {offsets = [0, 0], sizes = [2, 64], strides = [1, 1]} : vector<2x96xf32> to vector<2x64xf32>
    %182 = vector.extract_strided_slice %172 {offsets = [0, 0], sizes = [2, 64], strides = [1, 1]} : vector<2x96xf32> to vector<2x64xf32>
    %183 = arith.addf %181, %182 : vector<2x64xf32>
    %184 = arith.negf %183 : vector<2x64xf32>
    %185 = math.exp %184 : vector<2x64xf32>
    %cst_66 = arith.constant 1.000000e+00 : f32
    %186 = vector.broadcast %cst_66 : f32 to vector<2x64xf32>
    %187 = arith.addf %186, %185 : vector<2x64xf32>
    %188 = arith.divf %186, %187 : vector<2x64xf32>
    %189 = vector.extract_strided_slice %167 {offsets = [0, 64], sizes = [2, 32], strides = [1, 1]} : vector<2x96xf32> to vector<2x32xf32>
    %190 = vector.extract_strided_slice %180 {offsets = [0, 0], sizes = [2, 32], strides = [1, 1]} : vector<2x64xf32> to vector<2x32xf32>
    %191 = vector.extract_strided_slice %170 {offsets = [0, 64], sizes = [2, 32], strides = [1, 1]} : vector<2x96xf32> to vector<2x32xf32>
    %192 = arith.mulf %190, %191 : vector<2x32xf32>
    %193 = arith.addf %189, %192 : vector<2x32xf32>
    %194 = math.tanh %193 : vector<2x32xf32>
    %195 = vector.extract_strided_slice %168 {offsets = [0, 64], sizes = [2, 32], strides = [1, 1]} : vector<2x96xf32> to vector<2x32xf32>
    %196 = vector.extract_strided_slice %188 {offsets = [0, 0], sizes = [2, 32], strides = [1, 1]} : vector<2x64xf32> to vector<2x32xf32>
    %197 = vector.extract_strided_slice %172 {offsets = [0, 64], sizes = [2, 32], strides = [1, 1]} : vector<2x96xf32> to vector<2x32xf32>
    %198 = arith.mulf %196, %197 : vector<2x32xf32>
    %199 = arith.addf %195, %198 : vector<2x32xf32>
    %200 = math.tanh %199 : vector<2x32xf32>
    %201 = vector.extract_strided_slice %180 {offsets = [0, 32], sizes = [2, 32], strides = [1, 1]} : vector<2x64xf32> to vector<2x32xf32>
    %202 = vector.extract_strided_slice %188 {offsets = [0, 32], sizes = [2, 32], strides = [1, 1]} : vector<2x64xf32> to vector<2x32xf32>
    %cst_67 = arith.constant 1.000000e+00 : f32
    %203 = vector.broadcast %cst_67 : f32 to vector<2x32xf32>
    %204 = arith.subf %203, %201 : vector<2x32xf32>
    %205 = arith.mulf %204, %194 : vector<2x32xf32>
    %206 = arith.mulf %201, %159 : vector<2x32xf32>
    %207 = arith.addf %205, %206 : vector<2x32xf32>
    %cst_68 = arith.constant 1.000000e+00 : f32
    %208 = vector.broadcast %cst_68 : f32 to vector<2x32xf32>
    %209 = arith.subf %208, %202 : vector<2x32xf32>
    %210 = arith.mulf %209, %200 : vector<2x32xf32>
    %211 = arith.mulf %202, %164 : vector<2x32xf32>
    %212 = arith.addf %210, %211 : vector<2x32xf32>
    %c6_69 = arith.constant 6 : index
    %c0_70 = arith.constant 0 : index
    %213 = vector.load %arg23[%c6_69, %c0_70] : memref<16x32xf32, #tpu.memory_space<vmem>>, vector<2x32xf32>
    tpu.vector_store %arg23[%c6_69, %c0_70], %207 {strides = array<i32>} : memref<16x32xf32, #tpu.memory_space<vmem>>, vector<2x32xf32>,
    %c8_71 = arith.constant 8 : index
    %c0_72 = arith.constant 0 : index
    %214 = vector.load %arg24[%c8_71, %c0_72] : memref<16x32xf32, #tpu.memory_space<vmem>>, vector<2x32xf32>
    tpu.vector_store %arg24[%c8_71, %c0_72], %212 {strides = array<i32>} : memref<16x32xf32, #tpu.memory_space<vmem>>, vector<2x32xf32>,
    %c8_73 = arith.constant 8 : index
    %c0_74 = arith.constant 0 : index
    %215 = vector.load %arg21[%c8_73, %c0_74] : memref<16x96xf32, #tpu.memory_space<vmem>>, vector<2x96xf32>
    %c6_75 = arith.constant 6 : index
    %c0_76 = arith.constant 0 : index
    %216 = vector.load %arg22[%c6_75, %c0_76] : memref<16x96xf32, #tpu.memory_space<vmem>>, vector<2x96xf32>
    %cst_77 = arith.constant dense<0.000000e+00> : vector<2x96xf32>
    %217 = tpu.matmul %207, %13, %cst_77 {dimension_numbers = #tpu.dot_dimension_numbers<[1], [0], [0], [1], [0, 0, 1, 1], [], []>} : vector<2x32xf32>, vector<32x96xf32>, vector<2x96xf32> -> vector<2x96xf32>
    %218 = arith.addf %217, %17 : vector<2x96xf32>
    %cst_78 = arith.constant dense<0.000000e+00> : vector<2x96xf32>
    %219 = tpu.matmul %212, %14, %cst_78 {dimension_numbers = #tpu.dot_dimension_numbers<[1], [0], [0], [1], [0, 0, 1, 1], [], []>} : vector<2x32xf32>, vector<32x96xf32>, vector<2x96xf32> -> vector<2x96xf32>
    %220 = arith.addf %219, %20 : vector<2x96xf32>
    %221 = vector.extract_strided_slice %215 {offsets = [0, 0], sizes = [2, 64], strides = [1, 1]} : vector<2x96xf32> to vector<2x64xf32>
    %222 = vector.extract_strided_slice %218 {offsets = [0, 0], sizes = [2, 64], strides = [1, 1]} : vector<2x96xf32> to vector<2x64xf32>
    %223 = arith.addf %221, %222 : vector<2x64xf32>
    %224 = arith.negf %223 : vector<2x64xf32>
    %225 = math.exp %224 : vector<2x64xf32>
    %cst_79 = arith.constant 1.000000e+00 : f32
    %226 = vector.broadcast %cst_79 : f32 to vector<2x64xf32>
    %227 = arith.addf %226, %225 : vector<2x64xf32>
    %228 = arith.divf %226, %227 : vector<2x64xf32>
    %229 = vector.extract_strided_slice %216 {offsets = [0, 0], sizes = [2, 64], strides = [1, 1]} : vector<2x96xf32> to vector<2x64xf32>
    %230 = vector.extract_strided_slice %220 {offsets = [0, 0], sizes = [2, 64], strides = [1, 1]} : vector<2x96xf32> to vector<2x64xf32>
    %231 = arith.addf %229, %230 : vector<2x64xf32>
    %232 = arith.negf %231 : vector<2x64xf32>
    %233 = math.exp %232 : vector<2x64xf32>
    %cst_80 = arith.constant 1.000000e+00 : f32
    %234 = vector.broadcast %cst_80 : f32 to vector<2x64xf32>
    %235 = arith.addf %234, %233 : vector<2x64xf32>
    %236 = arith.divf %234, %235 : vector<2x64xf32>
    %237 = vector.extract_strided_slice %215 {offsets = [0, 64], sizes = [2, 32], strides = [1, 1]} : vector<2x96xf32> to vector<2x32xf32>
    %238 = vector.extract_strided_slice %228 {offsets = [0, 0], sizes = [2, 32], strides = [1, 1]} : vector<2x64xf32> to vector<2x32xf32>
    %239 = vector.extract_strided_slice %218 {offsets = [0, 64], sizes = [2, 32], strides = [1, 1]} : vector<2x96xf32> to vector<2x32xf32>
    %240 = arith.mulf %238, %239 : vector<2x32xf32>
    %241 = arith.addf %237, %240 : vector<2x32xf32>
    %242 = math.tanh %241 : vector<2x32xf32>
    %243 = vector.extract_strided_slice %216 {offsets = [0, 64], sizes = [2, 32], strides = [1, 1]} : vector<2x96xf32> to vector<2x32xf32>
    %244 = vector.extract_strided_slice %236 {offsets = [0, 0], sizes = [2, 32], strides = [1, 1]} : vector<2x64xf32> to vector<2x32xf32>
    %245 = vector.extract_strided_slice %220 {offsets = [0, 64], sizes = [2, 32], strides = [1, 1]} : vector<2x96xf32> to vector<2x32xf32>
    %246 = arith.mulf %244, %245 : vector<2x32xf32>
    %247 = arith.addf %243, %246 : vector<2x32xf32>
    %248 = math.tanh %247 : vector<2x32xf32>
    %249 = vector.extract_strided_slice %228 {offsets = [0, 32], sizes = [2, 32], strides = [1, 1]} : vector<2x64xf32> to vector<2x32xf32>
    %250 = vector.extract_strided_slice %236 {offsets = [0, 32], sizes = [2, 32], strides = [1, 1]} : vector<2x64xf32> to vector<2x32xf32>
    %cst_81 = arith.constant 1.000000e+00 : f32
    %251 = vector.broadcast %cst_81 : f32 to vector<2x32xf32>
    %252 = arith.subf %251, %249 : vector<2x32xf32>
    %253 = arith.mulf %252, %242 : vector<2x32xf32>
    %254 = arith.mulf %249, %207 : vector<2x32xf32>
    %255 = arith.addf %253, %254 : vector<2x32xf32>
    %cst_82 = arith.constant 1.000000e+00 : f32
    %256 = vector.broadcast %cst_82 : f32 to vector<2x32xf32>
    %257 = arith.subf %256, %250 : vector<2x32xf32>
    %258 = arith.mulf %257, %248 : vector<2x32xf32>
    %259 = arith.mulf %250, %212 : vector<2x32xf32>
    %260 = arith.addf %258, %259 : vector<2x32xf32>
    %c8_83 = arith.constant 8 : index
    %c0_84 = arith.constant 0 : index
    %261 = vector.load %arg23[%c8_83, %c0_84] : memref<16x32xf32, #tpu.memory_space<vmem>>, vector<2x32xf32>
    tpu.vector_store %arg23[%c8_83, %c0_84], %255 {strides = array<i32>} : memref<16x32xf32, #tpu.memory_space<vmem>>, vector<2x32xf32>,
    %c6_85 = arith.constant 6 : index
    %c0_86 = arith.constant 0 : index
    %262 = vector.load %arg24[%c6_85, %c0_86] : memref<16x32xf32, #tpu.memory_space<vmem>>, vector<2x32xf32>
    tpu.vector_store %arg24[%c6_85, %c0_86], %260 {strides = array<i32>} : memref<16x32xf32, #tpu.memory_space<vmem>>, vector<2x32xf32>,
    %c10_87 = arith.constant 10 : index
    %c0_88 = arith.constant 0 : index
    %263 = vector.load %arg21[%c10_87, %c0_88] : memref<16x96xf32, #tpu.memory_space<vmem>>, vector<2x96xf32>
    %c4_89 = arith.constant 4 : index
    %c0_90 = arith.constant 0 : index
    %264 = vector.load %arg22[%c4_89, %c0_90] : memref<16x96xf32, #tpu.memory_space<vmem>>, vector<2x96xf32>
    %cst_91 = arith.constant dense<0.000000e+00> : vector<2x96xf32>
    %265 = tpu.matmul %255, %13, %cst_91 {dimension_numbers = #tpu.dot_dimension_numbers<[1], [0], [0], [1], [0, 0, 1, 1], [], []>} : vector<2x32xf32>, vector<32x96xf32>, vector<2x96xf32> -> vector<2x96xf32>
    %266 = arith.addf %265, %17 : vector<2x96xf32>
    %cst_92 = arith.constant dense<0.000000e+00> : vector<2x96xf32>
    %267 = tpu.matmul %260, %14, %cst_92 {dimension_numbers = #tpu.dot_dimension_numbers<[1], [0], [0], [1], [0, 0, 1, 1], [], []>} : vector<2x32xf32>, vector<32x96xf32>, vector<2x96xf32> -> vector<2x96xf32>
    %268 = arith.addf %267, %20 : vector<2x96xf32>
    %269 = vector.extract_strided_slice %263 {offsets = [0, 0], sizes = [2, 64], strides = [1, 1]} : vector<2x96xf32> to vector<2x64xf32>
    %270 = vector.extract_strided_slice %266 {offsets = [0, 0], sizes = [2, 64], strides = [1, 1]} : vector<2x96xf32> to vector<2x64xf32>
    %271 = arith.addf %269, %270 : vector<2x64xf32>
    %272 = arith.negf %271 : vector<2x64xf32>
    %273 = math.exp %272 : vector<2x64xf32>
    %cst_93 = arith.constant 1.000000e+00 : f32
    %274 = vector.broadcast %cst_93 : f32 to vector<2x64xf32>
    %275 = arith.addf %274, %273 : vector<2x64xf32>
    %276 = arith.divf %274, %275 : vector<2x64xf32>
    %277 = vector.extract_strided_slice %264 {offsets = [0, 0], sizes = [2, 64], strides = [1, 1]} : vector<2x96xf32> to vector<2x64xf32>
    %278 = vector.extract_strided_slice %268 {offsets = [0, 0], sizes = [2, 64], strides = [1, 1]} : vector<2x96xf32> to vector<2x64xf32>
    %279 = arith.addf %277, %278 : vector<2x64xf32>
    %280 = arith.negf %279 : vector<2x64xf32>
    %281 = math.exp %280 : vector<2x64xf32>
    %cst_94 = arith.constant 1.000000e+00 : f32
    %282 = vector.broadcast %cst_94 : f32 to vector<2x64xf32>
    %283 = arith.addf %282, %281 : vector<2x64xf32>
    %284 = arith.divf %282, %283 : vector<2x64xf32>
    %285 = vector.extract_strided_slice %263 {offsets = [0, 64], sizes = [2, 32], strides = [1, 1]} : vector<2x96xf32> to vector<2x32xf32>
    %286 = vector.extract_strided_slice %276 {offsets = [0, 0], sizes = [2, 32], strides = [1, 1]} : vector<2x64xf32> to vector<2x32xf32>
    %287 = vector.extract_strided_slice %266 {offsets = [0, 64], sizes = [2, 32], strides = [1, 1]} : vector<2x96xf32> to vector<2x32xf32>
    %288 = arith.mulf %286, %287 : vector<2x32xf32>
    %289 = arith.addf %285, %288 : vector<2x32xf32>
    %290 = math.tanh %289 : vector<2x32xf32>
    %291 = vector.extract_strided_slice %264 {offsets = [0, 64], sizes = [2, 32], strides = [1, 1]} : vector<2x96xf32> to vector<2x32xf32>
    %292 = vector.extract_strided_slice %284 {offsets = [0, 0], sizes = [2, 32], strides = [1, 1]} : vector<2x64xf32> to vector<2x32xf32>
    %293 = vector.extract_strided_slice %268 {offsets = [0, 64], sizes = [2, 32], strides = [1, 1]} : vector<2x96xf32> to vector<2x32xf32>
    %294 = arith.mulf %292, %293 : vector<2x32xf32>
    %295 = arith.addf %291, %294 : vector<2x32xf32>
    %296 = math.tanh %295 : vector<2x32xf32>
    %297 = vector.extract_strided_slice %276 {offsets = [0, 32], sizes = [2, 32], strides = [1, 1]} : vector<2x64xf32> to vector<2x32xf32>
    %298 = vector.extract_strided_slice %284 {offsets = [0, 32], sizes = [2, 32], strides = [1, 1]} : vector<2x64xf32> to vector<2x32xf32>
    %cst_95 = arith.constant 1.000000e+00 : f32
    %299 = vector.broadcast %cst_95 : f32 to vector<2x32xf32>
    %300 = arith.subf %299, %297 : vector<2x32xf32>
    %301 = arith.mulf %300, %290 : vector<2x32xf32>
    %302 = arith.mulf %297, %255 : vector<2x32xf32>
    %303 = arith.addf %301, %302 : vector<2x32xf32>
    %cst_96 = arith.constant 1.000000e+00 : f32
    %304 = vector.broadcast %cst_96 : f32 to vector<2x32xf32>
    %305 = arith.subf %304, %298 : vector<2x32xf32>
    %306 = arith.mulf %305, %296 : vector<2x32xf32>
    %307 = arith.mulf %298, %260 : vector<2x32xf32>
    %308 = arith.addf %306, %307 : vector<2x32xf32>
    %c10_97 = arith.constant 10 : index
    %c0_98 = arith.constant 0 : index
    %309 = vector.load %arg23[%c10_97, %c0_98] : memref<16x32xf32, #tpu.memory_space<vmem>>, vector<2x32xf32>
    tpu.vector_store %arg23[%c10_97, %c0_98], %303 {strides = array<i32>} : memref<16x32xf32, #tpu.memory_space<vmem>>, vector<2x32xf32>,
    %c4_99 = arith.constant 4 : index
    %c0_100 = arith.constant 0 : index
    %310 = vector.load %arg24[%c4_99, %c0_100] : memref<16x32xf32, #tpu.memory_space<vmem>>, vector<2x32xf32>
    tpu.vector_store %arg24[%c4_99, %c0_100], %308 {strides = array<i32>} : memref<16x32xf32, #tpu.memory_space<vmem>>, vector<2x32xf32>,
    %c12_101 = arith.constant 12 : index
    %c0_102 = arith.constant 0 : index
    %311 = vector.load %arg21[%c12_101, %c0_102] : memref<16x96xf32, #tpu.memory_space<vmem>>, vector<2x96xf32>
    %c2_103 = arith.constant 2 : index
    %c0_104 = arith.constant 0 : index
    %312 = vector.load %arg22[%c2_103, %c0_104] : memref<16x96xf32, #tpu.memory_space<vmem>>, vector<2x96xf32>
    %cst_105 = arith.constant dense<0.000000e+00> : vector<2x96xf32>
    %313 = tpu.matmul %303, %13, %cst_105 {dimension_numbers = #tpu.dot_dimension_numbers<[1], [0], [0], [1], [0, 0, 1, 1], [], []>} : vector<2x32xf32>, vector<32x96xf32>, vector<2x96xf32> -> vector<2x96xf32>
    %314 = arith.addf %313, %17 : vector<2x96xf32>
    %cst_106 = arith.constant dense<0.000000e+00> : vector<2x96xf32>
    %315 = tpu.matmul %308, %14, %cst_106 {dimension_numbers = #tpu.dot_dimension_numbers<[1], [0], [0], [1], [0, 0, 1, 1], [], []>} : vector<2x32xf32>, vector<32x96xf32>, vector<2x96xf32> -> vector<2x96xf32>
    %316 = arith.addf %315, %20 : vector<2x96xf32>
    %317 = vector.extract_strided_slice %311 {offsets = [0, 0], sizes = [2, 64], strides = [1, 1]} : vector<2x96xf32> to vector<2x64xf32>
    %318 = vector.extract_strided_slice %314 {offsets = [0, 0], sizes = [2, 64], strides = [1, 1]} : vector<2x96xf32> to vector<2x64xf32>
    %319 = arith.addf %317, %318 : vector<2x64xf32>
    %320 = arith.negf %319 : vector<2x64xf32>
    %321 = math.exp %320 : vector<2x64xf32>
    %cst_107 = arith.constant 1.000000e+00 : f32
    %322 = vector.broadcast %cst_107 : f32 to vector<2x64xf32>
    %323 = arith.addf %322, %321 : vector<2x64xf32>
    %324 = arith.divf %322, %323 : vector<2x64xf32>
    %325 = vector.extract_strided_slice %312 {offsets = [0, 0], sizes = [2, 64], strides = [1, 1]} : vector<2x96xf32> to vector<2x64xf32>
    %326 = vector.extract_strided_slice %316 {offsets = [0, 0], sizes = [2, 64], strides = [1, 1]} : vector<2x96xf32> to vector<2x64xf32>
    %327 = arith.addf %325, %326 : vector<2x64xf32>
    %328 = arith.negf %327 : vector<2x64xf32>
    %329 = math.exp %328 : vector<2x64xf32>
    %cst_108 = arith.constant 1.000000e+00 : f32
    %330 = vector.broadcast %cst_108 : f32 to vector<2x64xf32>
    %331 = arith.addf %330, %329 : vector<2x64xf32>
    %332 = arith.divf %330, %331 : vector<2x64xf32>
    %333 = vector.extract_strided_slice %311 {offsets = [0, 64], sizes = [2, 32], strides = [1, 1]} : vector<2x96xf32> to vector<2x32xf32>
    %334 = vector.extract_strided_slice %324 {offsets = [0, 0], sizes = [2, 32], strides = [1, 1]} : vector<2x64xf32> to vector<2x32xf32>
    %335 = vector.extract_strided_slice %314 {offsets = [0, 64], sizes = [2, 32], strides = [1, 1]} : vector<2x96xf32> to vector<2x32xf32>
    %336 = arith.mulf %334, %335 : vector<2x32xf32>
    %337 = arith.addf %333, %336 : vector<2x32xf32>
    %338 = math.tanh %337 : vector<2x32xf32>
    %339 = vector.extract_strided_slice %312 {offsets = [0, 64], sizes = [2, 32], strides = [1, 1]} : vector<2x96xf32> to vector<2x32xf32>
    %340 = vector.extract_strided_slice %332 {offsets = [0, 0], sizes = [2, 32], strides = [1, 1]} : vector<2x64xf32> to vector<2x32xf32>
    %341 = vector.extract_strided_slice %316 {offsets = [0, 64], sizes = [2, 32], strides = [1, 1]} : vector<2x96xf32> to vector<2x32xf32>
    %342 = arith.mulf %340, %341 : vector<2x32xf32>
    %343 = arith.addf %339, %342 : vector<2x32xf32>
    %344 = math.tanh %343 : vector<2x32xf32>
    %345 = vector.extract_strided_slice %324 {offsets = [0, 32], sizes = [2, 32], strides = [1, 1]} : vector<2x64xf32> to vector<2x32xf32>
    %346 = vector.extract_strided_slice %332 {offsets = [0, 32], sizes = [2, 32], strides = [1, 1]} : vector<2x64xf32> to vector<2x32xf32>
    %cst_109 = arith.constant 1.000000e+00 : f32
    %347 = vector.broadcast %cst_109 : f32 to vector<2x32xf32>
    %348 = arith.subf %347, %345 : vector<2x32xf32>
    %349 = arith.mulf %348, %338 : vector<2x32xf32>
    %350 = arith.mulf %345, %303 : vector<2x32xf32>
    %351 = arith.addf %349, %350 : vector<2x32xf32>
    %cst_110 = arith.constant 1.000000e+00 : f32
    %352 = vector.broadcast %cst_110 : f32 to vector<2x32xf32>
    %353 = arith.subf %352, %346 : vector<2x32xf32>
    %354 = arith.mulf %353, %344 : vector<2x32xf32>
    %355 = arith.mulf %346, %308 : vector<2x32xf32>
    %356 = arith.addf %354, %355 : vector<2x32xf32>
    %c12_111 = arith.constant 12 : index
    %c0_112 = arith.constant 0 : index
    %357 = vector.load %arg23[%c12_111, %c0_112] : memref<16x32xf32, #tpu.memory_space<vmem>>, vector<2x32xf32>
    tpu.vector_store %arg23[%c12_111, %c0_112], %351 {strides = array<i32>} : memref<16x32xf32, #tpu.memory_space<vmem>>, vector<2x32xf32>,
    %c2_113 = arith.constant 2 : index
    %c0_114 = arith.constant 0 : index
    %358 = vector.load %arg24[%c2_113, %c0_114] : memref<16x32xf32, #tpu.memory_space<vmem>>, vector<2x32xf32>
    tpu.vector_store %arg24[%c2_113, %c0_114], %356 {strides = array<i32>} : memref<16x32xf32, #tpu.memory_space<vmem>>, vector<2x32xf32>,
    %c14_115 = arith.constant 14 : index
    %c0_116 = arith.constant 0 : index
    %359 = vector.load %arg21[%c14_115, %c0_116] : memref<16x96xf32, #tpu.memory_space<vmem>>, vector<2x96xf32>
    %c0_117 = arith.constant 0 : index
    %c0_118 = arith.constant 0 : index
    %360 = vector.load %arg22[%c0_117, %c0_118] : memref<16x96xf32, #tpu.memory_space<vmem>>, vector<2x96xf32>
    %cst_119 = arith.constant dense<0.000000e+00> : vector<2x96xf32>
    %361 = tpu.matmul %351, %13, %cst_119 {dimension_numbers = #tpu.dot_dimension_numbers<[1], [0], [0], [1], [0, 0, 1, 1], [], []>} : vector<2x32xf32>, vector<32x96xf32>, vector<2x96xf32> -> vector<2x96xf32>
    %362 = arith.addf %361, %17 : vector<2x96xf32>
    %cst_120 = arith.constant dense<0.000000e+00> : vector<2x96xf32>
    %363 = tpu.matmul %356, %14, %cst_120 {dimension_numbers = #tpu.dot_dimension_numbers<[1], [0], [0], [1], [0, 0, 1, 1], [], []>} : vector<2x32xf32>, vector<32x96xf32>, vector<2x96xf32> -> vector<2x96xf32>
    %364 = arith.addf %363, %20 : vector<2x96xf32>
    %365 = vector.extract_strided_slice %359 {offsets = [0, 0], sizes = [2, 64], strides = [1, 1]} : vector<2x96xf32> to vector<2x64xf32>
    %366 = vector.extract_strided_slice %362 {offsets = [0, 0], sizes = [2, 64], strides = [1, 1]} : vector<2x96xf32> to vector<2x64xf32>
    %367 = arith.addf %365, %366 : vector<2x64xf32>
    %368 = arith.negf %367 : vector<2x64xf32>
    %369 = math.exp %368 : vector<2x64xf32>
    %cst_121 = arith.constant 1.000000e+00 : f32
    %370 = vector.broadcast %cst_121 : f32 to vector<2x64xf32>
    %371 = arith.addf %370, %369 : vector<2x64xf32>
    %372 = arith.divf %370, %371 : vector<2x64xf32>
    %373 = vector.extract_strided_slice %360 {offsets = [0, 0], sizes = [2, 64], strides = [1, 1]} : vector<2x96xf32> to vector<2x64xf32>
    %374 = vector.extract_strided_slice %364 {offsets = [0, 0], sizes = [2, 64], strides = [1, 1]} : vector<2x96xf32> to vector<2x64xf32>
    %375 = arith.addf %373, %374 : vector<2x64xf32>
    %376 = arith.negf %375 : vector<2x64xf32>
    %377 = math.exp %376 : vector<2x64xf32>
    %cst_122 = arith.constant 1.000000e+00 : f32
    %378 = vector.broadcast %cst_122 : f32 to vector<2x64xf32>
    %379 = arith.addf %378, %377 : vector<2x64xf32>
    %380 = arith.divf %378, %379 : vector<2x64xf32>
    %381 = vector.extract_strided_slice %359 {offsets = [0, 64], sizes = [2, 32], strides = [1, 1]} : vector<2x96xf32> to vector<2x32xf32>
    %382 = vector.extract_strided_slice %372 {offsets = [0, 0], sizes = [2, 32], strides = [1, 1]} : vector<2x64xf32> to vector<2x32xf32>
    %383 = vector.extract_strided_slice %362 {offsets = [0, 64], sizes = [2, 32], strides = [1, 1]} : vector<2x96xf32> to vector<2x32xf32>
    %384 = arith.mulf %382, %383 : vector<2x32xf32>
    %385 = arith.addf %381, %384 : vector<2x32xf32>
    %386 = math.tanh %385 : vector<2x32xf32>
    %387 = vector.extract_strided_slice %360 {offsets = [0, 64], sizes = [2, 32], strides = [1, 1]} : vector<2x96xf32> to vector<2x32xf32>
    %388 = vector.extract_strided_slice %380 {offsets = [0, 0], sizes = [2, 32], strides = [1, 1]} : vector<2x64xf32> to vector<2x32xf32>
    %389 = vector.extract_strided_slice %364 {offsets = [0, 64], sizes = [2, 32], strides = [1, 1]} : vector<2x96xf32> to vector<2x32xf32>
    %390 = arith.mulf %388, %389 : vector<2x32xf32>
    %391 = arith.addf %387, %390 : vector<2x32xf32>
    %392 = math.tanh %391 : vector<2x32xf32>
    %393 = vector.extract_strided_slice %372 {offsets = [0, 32], sizes = [2, 32], strides = [1, 1]} : vector<2x64xf32> to vector<2x32xf32>
    %394 = vector.extract_strided_slice %380 {offsets = [0, 32], sizes = [2, 32], strides = [1, 1]} : vector<2x64xf32> to vector<2x32xf32>
    %cst_123 = arith.constant 1.000000e+00 : f32
    %395 = vector.broadcast %cst_123 : f32 to vector<2x32xf32>
    %396 = arith.subf %395, %393 : vector<2x32xf32>
    %397 = arith.mulf %396, %386 : vector<2x32xf32>
    %398 = arith.mulf %393, %351 : vector<2x32xf32>
    %399 = arith.addf %397, %398 : vector<2x32xf32>
    %cst_124 = arith.constant 1.000000e+00 : f32
    %400 = vector.broadcast %cst_124 : f32 to vector<2x32xf32>
    %401 = arith.subf %400, %394 : vector<2x32xf32>
    %402 = arith.mulf %401, %392 : vector<2x32xf32>
    %403 = arith.mulf %394, %356 : vector<2x32xf32>
    %404 = arith.addf %402, %403 : vector<2x32xf32>
    %c14_125 = arith.constant 14 : index
    %c0_126 = arith.constant 0 : index
    %405 = vector.load %arg23[%c14_125, %c0_126] : memref<16x32xf32, #tpu.memory_space<vmem>>, vector<2x32xf32>
    tpu.vector_store %arg23[%c14_125, %c0_126], %399 {strides = array<i32>} : memref<16x32xf32, #tpu.memory_space<vmem>>, vector<2x32xf32>,
    %c0_127 = arith.constant 0 : index
    %c0_128 = arith.constant 0 : index
    %406 = vector.load %arg24[%c0_127, %c0_128] : memref<16x32xf32, #tpu.memory_space<vmem>>, vector<2x32xf32>
    tpu.vector_store %arg24[%c0_127, %c0_128], %404 {strides = array<i32>} : memref<16x32xf32, #tpu.memory_space<vmem>>, vector<2x32xf32>,
    %c0_129 = arith.constant 0 : index
    %c0_130 = arith.constant 0 : index
    %c0_131 = arith.constant 0 : index
    %407 = vector.load %arg19[%c0_129, %c0_130, %c0_131] : memref<2x2x32xf32, #tpu.memory_space<vmem>>, vector<1x2x32xf32>
    %408 = vector.shape_cast %407 : vector<1x2x32xf32> to vector<2x32xf32>
    %409 = vector.shape_cast %399 : vector<2x32xf32> to vector<1x2x32xf32>
    tpu.vector_store %arg19[%c0_129, %c0_130, %c0_131], %409 {strides = array<i32>} : memref<2x2x32xf32, #tpu.memory_space<vmem>>, vector<1x2x32xf32>,
    %c1 = arith.constant 1 : index
    %c0_132 = arith.constant 0 : index
    %c0_133 = arith.constant 0 : index
    %410 = vector.load %arg19[%c1, %c0_132, %c0_133] : memref<2x2x32xf32, #tpu.memory_space<vmem>>, vector<1x2x32xf32>
    %411 = vector.shape_cast %410 : vector<1x2x32xf32> to vector<2x32xf32>
    %412 = vector.shape_cast %404 : vector<2x32xf32> to vector<1x2x32xf32>
    tpu.vector_store %arg19[%c1, %c0_132, %c0_133], %412 {strides = array<i32>} : memref<2x2x32xf32, #tpu.memory_space<vmem>>, vector<1x2x32xf32>,
    %c0_134 = arith.constant 0 : index
    %c0_135 = arith.constant 0 : index
    %413 = vector.load %arg1[%c0_134, %c0_135] : memref<16x2xf32, #tpu.memory_space<vmem>>, vector<16x2xf32>
    %c0_136 = arith.constant 0 : index
    %c0_137 = arith.constant 0 : index
    %414 = vector.load %arg2[%c0_136, %c0_137] : memref<2x16xf32, #tpu.memory_space<vmem>>, vector<2x16xf32>
    %c0_138 = arith.constant 0 : index
    %c0_139 = arith.constant 0 : index
    %415 = vector.load %arg3[%c0_138, %c0_139] : memref<16x8xf32, #tpu.memory_space<vmem>>, vector<16x8xf32>
    %c0_140 = arith.constant 0 : index
    %c0_141 = arith.constant 0 : index
    %416 = vector.load %arg23[%c0_140, %c0_141] : memref<16x32xf32, #tpu.memory_space<vmem>>, vector<16x32xf32>
    %c0_142 = arith.constant 0 : index
    %c0_143 = arith.constant 0 : index
    %417 = vector.load %arg24[%c0_142, %c0_143] : memref<16x32xf32, #tpu.memory_space<vmem>>, vector<16x32xf32>
    %418 = tpu.concatenate %416, %417 in 1 : vector<16x32xf32>, vector<16x32xf32> -> vector<16x64xf32>
    %c0_144 = arith.constant 0 : index
    %c0_145 = arith.constant 0 : index
    %419 = vector.load %arg12[%c0_144, %c0_145] : memref<32x32xf32, #tpu.memory_space<vmem>>, vector<32x32xf32>
    %cst_146 = arith.constant dense<0.000000e+00> : vector<2x32xf32>
    %420 = tpu.matmul %404, %419, %cst_146 {dimension_numbers = #tpu.dot_dimension_numbers<[1], [0], [0], [1], [0, 0, 1, 1], [], []>} : vector<2x32xf32>, vector<32x32xf32>, vector<2x32xf32> -> vector<2x32xf32>
    %c0_147 = arith.constant 0 : index
    %c0_148 = arith.constant 0 : index
    %421 = vector.load %arg14[%c0_147, %c0_148] : memref<1x32xf32, #tpu.memory_space<vmem>>, vector<1x32xf32>
    %422 = vector.broadcast %421 : vector<1x32xf32> to vector<2x32xf32>
    %423 = arith.addf %420, %422 : vector<2x32xf32>
    %cst_149 = arith.constant dense<0.000000e+00> : vector<16x32xf32>
    %424 = tpu.matmul %413, %423, %cst_149 {dimension_numbers = #tpu.dot_dimension_numbers<[1], [0], [0], [1], [0, 0, 1, 1], [], []>} : vector<16x2xf32>, vector<2x32xf32>, vector<16x32xf32> -> vector<16x32xf32>
    %c0_150 = arith.constant 0 : index
    %c0_151 = arith.constant 0 : index
    %425 = vector.load %arg13[%c0_150, %c0_151] : memref<64x32xf32, #tpu.memory_space<vmem>>, vector<64x32xf32>
    %cst_152 = arith.constant dense<0.000000e+00> : vector<16x32xf32>
    %426 = tpu.matmul %418, %425, %cst_152 {dimension_numbers = #tpu.dot_dimension_numbers<[1], [0], [0], [1], [0, 0, 1, 1], [], []>} : vector<16x64xf32>, vector<64x32xf32>, vector<16x32xf32> -> vector<16x32xf32>
    %427 = arith.addf %426, %424 : vector<16x32xf32>
    %428 = math.tanh %427 : vector<16x32xf32>
    %c0_153 = arith.constant 0 : index
    %c0_154 = arith.constant 0 : index
    %429 = vector.load %arg15[%c0_153, %c0_154] : memref<1x32xf32, #tpu.memory_space<vmem>>, vector<1x32xf32>
    %430 = vector.shape_cast %429 : vector<1x32xf32> to vector<1x32xf32>
    %431 = vector.broadcast %430 : vector<1x32xf32> to vector<16x32xf32>
    %432 = arith.mulf %428, %431 : vector<16x32xf32>
    %cst_155 = arith.constant dense<0.000000e+00> : vector<16xf32>
    %433 = vector.multi_reduction <add>, %432, %cst_155 [1] : vector<16x32xf32> to vector<16xf32>
    %434 = vector.shape_cast %433 : vector<16xf32> to vector<16x1xf32>
    %435 = vector.broadcast %434 : vector<16x1xf32> to vector<16x8xf32>
    %436 = arith.mulf %415, %435 : vector<16x8xf32>
    %cst_156 = arith.constant dense<0.000000e+00> : vector<2x8xf32>
    %437 = tpu.matmul %414, %436, %cst_156 {dimension_numbers = #tpu.dot_dimension_numbers<[1], [0], [0], [1], [0, 0, 1, 1], [], []>} : vector<2x16xf32>, vector<16x8xf32>, vector<2x8xf32> -> vector<2x8xf32>
    %cst_157 = arith.constant dense<0xFF800000> : vector<2xf32>
    %438 = vector.multi_reduction <maximumf>, %437, %cst_157 [1] : vector<2x8xf32> to vector<2xf32>
    %439 = vector.shape_cast %438 : vector<2xf32> to vector<2x1xf32>
    %440 = vector.broadcast %439 : vector<2x1xf32> to vector<2x8xf32>
    %441 = arith.subf %437, %440 : vector<2x8xf32>
    %442 = math.exp %441 : vector<2x8xf32>
    %cst_158 = arith.constant dense<0.000000e+00> : vector<2xf32>
    %443 = vector.multi_reduction <add>, %442, %cst_158 [1] : vector<2x8xf32> to vector<2xf32>
    %444 = vector.shape_cast %443 : vector<2xf32> to vector<2x1xf32>
    %445 = tpu.reciprocal %444 {approx = true} : vector<2x1xf32> -> vector<2x1xf32>
    %446 = vector.broadcast %445 : vector<2x1xf32> to vector<2x8xf32>
    %447 = arith.mulf %442, %446 : vector<2x8xf32>
    %448 = vector.shape_cast %447 : vector<2x8xf32> to vector<2x1x8xf32>
    %c0_159 = arith.constant 0 : index
    %c0_160 = arith.constant 0 : index
    %c0_161 = arith.constant 0 : index
    %449 = vector.load %arg20[%c0_159, %c0_160, %c0_161] : memref<2x1x8xf32, #tpu.memory_space<vmem>>, vector<2x1x8xf32>
    tpu.vector_store %arg20[%c0_159, %c0_160, %c0_161], %448 {strides = array<i32>} : memref<2x1x8xf32, #tpu.memory_space<vmem>>, vector<2x1x8xf32>,
    %cst_162 = arith.constant dense<0.000000e+00> : vector<16x8xf32>
    %450 = tpu.matmul %413, %447, %cst_162 {dimension_numbers = #tpu.dot_dimension_numbers<[1], [0], [0], [1], [0, 0, 1, 1], [], []>} : vector<16x2xf32>, vector<2x8xf32>, vector<16x8xf32> -> vector<16x8xf32>
    %451 = arith.mulf %450, %415 : vector<16x8xf32>
    %cst_163 = arith.constant dense<0.000000e+00> : vector<16xf32>
    %452 = vector.multi_reduction <add>, %451, %cst_163 [1] : vector<16x8xf32> to vector<16xf32>
    %453 = vector.shape_cast %452 : vector<16xf32> to vector<16x1xf32>
    %454 = vector.broadcast %453 : vector<16x1xf32> to vector<16x64xf32>
    %455 = arith.mulf %454, %418 : vector<16x64xf32>
    %cst_164 = arith.constant dense<0.000000e+00> : vector<2x64xf32>
    %456 = tpu.matmul %414, %455, %cst_164 {dimension_numbers = #tpu.dot_dimension_numbers<[1], [0], [0], [1], [0, 0, 1, 1], [], []>} : vector<2x16xf32>, vector<16x64xf32>, vector<2x64xf32> -> vector<2x64xf32>
    %c0_165 = arith.constant 0 : index
    %c0_166 = arith.constant 0 : index
    %457 = vector.load %arg16[%c0_165, %c0_166] : memref<64x5xf32, #tpu.memory_space<vmem>>, vector<64x5xf32>
    %cst_167 = arith.constant dense<0.000000e+00> : vector<2x5xf32>
    %458 = tpu.matmul %456, %457, %cst_167 {dimension_numbers = #tpu.dot_dimension_numbers<[1], [0], [0], [1], [0, 0, 1, 1], [], []>} : vector<2x64xf32>, vector<64x5xf32>, vector<2x5xf32> -> vector<2x5xf32>
    %c0_168 = arith.constant 0 : index
    %c0_169 = arith.constant 0 : index
    %459 = vector.load %arg17[%c0_168, %c0_169] : memref<1x5xf32, #tpu.memory_space<vmem>>, vector<1x5xf32>
    %460 = vector.broadcast %459 : vector<1x5xf32> to vector<2x5xf32>
    %461 = arith.addf %458, %460 : vector<2x5xf32>
    %cst_170 = arith.constant dense<0xFF800000> : vector<2xf32>
    %462 = vector.multi_reduction <maximumf>, %461, %cst_170 [1] : vector<2x5xf32> to vector<2xf32>
    %463 = vector.shape_cast %462 : vector<2xf32> to vector<2x1xf32>
    %464 = vector.broadcast %463 : vector<2x1xf32> to vector<2x5xf32>
    %465 = arith.subf %461, %464 : vector<2x5xf32>
    %466 = math.exp %465 : vector<2x5xf32>
    %cst_171 = arith.constant dense<0.000000e+00> : vector<2xf32>
    %467 = vector.multi_reduction <add>, %466, %cst_171 [1] : vector<2x5xf32> to vector<2xf32>
    %468 = vector.shape_cast %467 : vector<2xf32> to vector<2x1xf32>
    %469 = math.log %468 : vector<2x1xf32>
    %470 = arith.addf %469, %463 : vector<2x1xf32>
    %471 = vector.broadcast %470 : vector<2x1xf32> to vector<2x5xf32>
    %472 = arith.subf %461, %471 : vector<2x5xf32>
    %c0_172 = arith.constant 0 : index
    %c0_173 = arith.constant 0 : index
    %473 = vector.load %arg18[%c0_172, %c0_173] : memref<2x5xf32, #tpu.memory_space<vmem>>, vector<2x5xf32>
    tpu.vector_store %arg18[%c0_172, %c0_173], %472 {strides = array<i32>} : memref<2x5xf32, #tpu.memory_space<vmem>>, vector<2x5xf32>,
    return
  }
}

</mosaic_0001>

<bundles_post_ra>
// kernel: tpu_custom_call.1
= control target key start
LH: loop header
LB: loop body
LE: loop exit
PB: predicated region body
PF: predicated region fallthrough
CT: control target
= control target key end

     0   :  { %s4092_s0 = inlined_call_operand.vmem [shape: f32[16,32], index: 0, kind: input, shape index: {}]   ;;  %s4093_s1 = inlined_call_operand.vmem [shape: f32[16,2], index: 1, kind: input, shape index: {}]   ;;  %s4094_s2 = inlined_call_operand.vmem [shape: f32[2,16], index: 2, kind: input, shape index: {}]   ;;  %s4095_s3 = inlined_call_operand.vmem [shape: f32[16,8], index: 3, kind: input, shape index: {}]   ;;  %s4096_s4 = inlined_call_operand.vmem [shape: f32[32,96], index: 4, kind: input, shape index: {}]   ;;  %s4097_s5 = inlined_call_operand.vmem [shape: f32[1,96], index: 5, kind: input, shape index: {}]   ;;  %s4098_s6 = inlined_call_operand.vmem [shape: f32[32,96], index: 6, kind: input, shape index: {}]   ;;  %s4099_s7 = inlined_call_operand.vmem [shape: f32[1,96], index: 7, kind: input, shape index: {}]   ;;  %s4100_s8 = inlined_call_operand.vmem [shape: f32[32,96], index: 8, kind: input, shape index: {}]   ;;  %s4101_s9 = inlined_call_operand.vmem [shape: f32[1,96], index: 9, kind: input, shape index: {}]   ;;  %s4102_s10 = inlined_call_operand.vmem [shape: f32[32,96], index: 10, kind: input, shape index: {}]   ;;  %s4103_s11 = inlined_call_operand.vmem [shape: f32[1,96], index: 11, kind: input, shape index: {}]   ;;  %s4104_s12 = inlined_call_operand.vmem [shape: f32[32,32], index: 12, kind: input, shape index: {}]   ;;  %s4105_s13 = inlined_call_operand.vmem [shape: f32[64,32], index: 13, kind: input, shape index: {}]   ;;  %s4106_s14 = inlined_call_operand.vmem [shape: f32[1,32], index: 14, kind: input, shape index: {}]   ;;  %s4107_s15 = inlined_call_operand.vmem [shape: f32[1,32], index: 15, kind: input, shape index: {}]   ;;  %s4108_s16 = inlined_call_operand.vmem [shape: f32[64,5], index: 16, kind: input, shape index: {}]   ;;  %s4109_s17 = inlined_call_operand.vmem [shape: f32[1,5], index: 17, kind: input, shape index: {}]   ;;  %s4110_s18 = inlined_call_operand.hbm [shape: f32[2,5], index: 18, kind: output, shape index: {0}]   ;;  %s4111_s19 = inlined_call_operand.hbm [shape: f32[2,2,32], index: 19, kind: output, shape index: {1}]   ;;  %s4112_s20 = inlined_call_operand.hbm [shape: f32[2,1,8], index: 20, kind: output, shape index: {2}]  }
   0x1   :  { %4117 = sst [smem:[#allocation13_spill]] %s4092_s0 }
   0x2   :  { %4118 = sst [smem:[#allocation14_spill]] %s4093_s1 }
   0x3   :  { %4119 = sst [smem:[#allocation15_spill]] %s4094_s2 }
   0x4   :  { %4120 = sst [smem:[#allocation16_spill]] %s4095_s3 }
   0x5   :  { %4121 = sst [smem:[#allocation17_spill]] %s4096_s4 }
   0x6   :  { %26 = vsyncpa [#allocation7], 0  ;;  %s4122_s23 = sld [smem:[#allocation17_spill]]  ;;  %vm77_vm0 = vcmask 261120   ;;  %s4123_s29 = sld [smem:[#allocation13_spill]]  ;;  %v3453_v6 = vmov 0.0|0.0  }
   0x7   :  { %3124 = vmatprep.subr.bf16.mxu0 %v3453_v6  ;;  %v162_v8 = vld [vmem:[%s4100_s8] sm:$0xff]  ;;  %v163_v9 = vld [vmem:[%s4100_s8 + $0x8] sm:$0xff]  ;;  %vm3454_vm1 = vmmov 0   ;;  %v3455_v11 = vmov 0.0   ;;  %v252_v14 = vld [vmem:[%s4098_s6 + $0x10] sm:$0xff] }
   0x8   :  { %v250_v10 = vld [vmem:[%s4098_s6] sm:$0xff]  ;;  %2867 = vmatprep.mubr.msk.f32.mxu0 %vm3454_vm1, %v3455_v11  ;;  %v251_v12 = vld [vmem:[%s4098_s6 + $0x8] sm:$0xff]  ;;  %v253_v15 = vld [vmem:[%s4098_s6 + $0x18] sm:$0xff]  ;;  %v3116_v16 = vpack.c.bf16 %v163_v9, %v162_v8 }
   0x9   :  { %v3602_v13 = vpack.c.bf16 %v251_v12, %v250_v10  ;;  %v164_v17 = vld [vmem:[%s4100_s8 + $0x10] sm:$0xff]  ;;  %v165_v18 = vld [vmem:[%s4100_s8 + $0x18] sm:$0xff]  ;;  %v3617_v19 = vpack.c.bf16 %v253_v15, %v252_v14 }
   0xb   :  { %3126 = vmatpush3.bf16.msra.mxu0 %v3602_v13 }
   0xc   :  { %v66_v0 = vld [vmem:[%s4122_s23] sm:$0xff]  ;;  %v67_v1 = vld [vmem:[%s4122_s23 + $0x8] sm:$0xff]  ;;  %v68_v2 = vld [vmem:[%s4122_s23 + $0x10] sm:$0xff] }
   0xd   :  { %v3108_v3 = vpack.c.bf16 %v67_v1, %v66_v0  ;;  %v69_v4 = vld [vmem:[%s4122_s23 + $0x18] sm:$0xff]  ;;  %v64_v5 = vld [vmem:[%s4123_s29] sm:$0xff] }
   0xe   :  { %v3112_v7 = vpack.c.bf16 %v69_v4, %v68_v2  ;;  %2845 = vmatprep.mubr.msk.f32.mxu1 %vm77_vm0, %v64_v5 }
   0xf   :  { %3109 = vmatprep.subr.bf16.mxu1 %v3108_v3 }
  0x10   :  { %3111 = vmatpush3.bf16.msra.mxu1 %v3108_v3 }
  0x11   :  { %3113 = vmatprep.subr.bf16.mxu1 %v3112_v7 }
  0x12   :  { %27 = vsyncpa [#allocation9], 0  ;;  %3127 = vmatprep.subr.bf16.mxu0 %v3453_v6  ;;  %v65_v20 = vld [vmem:[%s4123_s29 + $0x8] sm:$0xff]  ;;  %v3120_v21 = vpack.c.bf16 %v165_v18, %v164_v17  ;;  %v254_v22 = vld [vmem:[%s4102_s10] sm:$0xff]  ;;  %vm159_vm2 = vcmask 785408   ;;  %s3456_s4 = smov 64  }
  0x13   :  { %3129 = vmatpush3.bf16.msra.mxu0 %v3617_v19  ;;  %v255_v23 = vld [vmem:[%s4102_s10 + $0x8] sm:$0xff]  ;;  %v256_v25 = vld [vmem:[%s4102_s10 + $0x10] sm:$0xff]  ;;  %v257_v26 = vld [vmem:[%s4102_s10 + $0x18] sm:$0xff]  ;;  %s3457_s30 = smov 96   ;;  %vm473_vm3 = vcmask 254976   ;;  %s4124_s2 = sld [smem:[#allocation14_spill]] }
  0x14   :  { %3115 = vmatpush3.bf16.msra.mxu1 %v3112_v7  ;;  %3136 = vmatprep.subr.bf16.mxu0 %v3453_v6  ;;  %v3638_v24 = vpack.c.bf16 %v255_v23, %v254_v22  ;;  %v3651_v27 = vpack.c.bf16 %v257_v26, %v256_v25  ;;  %v2656_v28 = vld [vmem:[%s4097_s5] ss:$0 sm:$0xff]  ;;  %vm2041_vm4 = vcmask 15360   ;;  %vm2048_vm5 = vcmask 1041408   ;;  %s4125_s25 = sld [smem:[#allocation16_spill]]  ;;  %s4126_s27 = sld [smem:[#allocation15_spill]] }
  0x15   :  { %3117 = vmatprep.subr.bf16.mxu1 %v3116_v16  ;;  %v2659_v35 = vld [vmem:[%s4101_s9] ss:$0 sm:$0xff]  ;;  %vm2135_vm6 = vcmask 523264   ;;  %vm2236_vm7 = vcmask 130048   ;;  %vm2310_vm8 = vcmask 58368   ;;  %vm2347_vm9 = vcmask 57344  }
  0x16   :  { %2868 = vmatmul.mubr.f32.vlgmr.msra.gmra.mrb[0].mxu0 %v3455_v11  ;;  %v3674_v40 = vld [vmem:[%s4103_s11] ss:$0 sm:$0xff]  ;;  %vm2429_vm10 = vcmask 64512   ;;  %vm2596_vm11 = vcmask 33792  }
  0x17   :  { %2846 = vmatmul.mubr.msk.f32.vlgmr.msra.gmra.mrb[0].mxu1 %vm77_vm0, %v65_v20  ;;  %3138 = vmatpush3.bf16.msra.mxu0 %v3602_v13  ;;  %v3681_v52 = vld [vmem:[%s4099_s7] ss:$0 sm:$0xff] }
  0x18   :  { %3119 = vmatpush3.bf16.msra.mxu1 %v3116_v16  ;;  %2856 = vmatprep.mubr.msk.f32.mxu1 %vm77_vm0, %v64_v5 }
  0x19   :  { %3121 = vmatprep.subr.bf16.mxu1 %v3120_v21  ;;  %2889 = vmatprep.mubr.msk.f32.mxu0 %vm3454_vm1, %v3455_v11 }
  0x1a   :  { %3139 = vmatprep.subr.bf16.mxu0 %v3453_v6 }
  0x1b   :  { %3141 = vmatpush3.bf16.msra.mxu0 %v3617_v19 }
  0x1c   :  { %3123 = vmatpush3.bf16.msra.mxu1 %v3120_v21  ;;  %3148 = vmatprep.subr.bf16.mxu0 %v3453_v6 }
  0x1d   :  { %3130 = vmatprep.subr.bf16.mxu1 %v3453_v6 }
  0x1f   :  { %2857 = vmatmul.mubr.msk.f32.vlgmr.msra.gmra.mrb[2].mxu1 %vm77_vm0, %v65_v20 }
  0x20   :  { %3132 = vmatpush3.bf16.msra.mxu1 %v3638_v24  ;;  %2878 = vmatprep.mubr.msk.f32.mxu1 %vm3454_vm1, %v3455_v11 }
  0x21   :  { %3133 = vmatprep.subr.bf16.mxu1 %v3453_v6 }
  0x24   :  { %3135 = vmatpush3.bf16.msra.mxu1 %v3651_v27 }
  0x25   :  { %3142 = vmatprep.subr.bf16.mxu1 %v3453_v6 }
  0x27   :  { %2879 = vmatmul.mubr.f32.vlgmr.msra.gmra.mrb[4].mxu1 %v3455_v11 }
  0x28   :  { %3144 = vmatpush3.bf16.msra.mxu1 %v3638_v24  ;;  %2900 = vmatprep.mubr.msk.f32.mxu1 %vm3454_vm1, %v3455_v11 }
  0x29   :  { %3145 = vmatprep.subr.bf16.mxu1 %v3453_v6 }
  0x2c   :  { %3147 = vmatpush3.bf16.msra.mxu1 %v3651_v27 }
  0x2d   :  { %3154 = vmatprep.subr.bf16.mxu1 %v3453_v6 }
  0xe9   :  { %v343_v33 = vpop.f32.mrb[0].mxu0 }
  0xea   :  { %v2847_v29 = vpop.f32.mrb[0].mxu1  ;;  %v2869_v34 = vpop.f32.mrb[1].mxu0  ;;  %v344_v53 = vadd.f32 %v3681_v52, %v343_v33 }
  0xeb   :  { %v156_v30 = vadd.f32 %v2847_v29, %v2656_v28  ;;  %v150_v31 = vpop.f32.mrb[1].mxu1 }
  0xec   :  { %v151_v32 = vadd.f32 %v2656_v28, %v150_v31 }
  0xed   :  { %161 = vst.msk [vmem:[#allocation2 + $0x8] sm:$0xff] %vm159_vm2, %v156_v30 }
  0xee   :  { %160 = vst.msk [vmem:[#allocation2] sm:$0xff] %vm159_vm2, %v151_v32 }
  0xf2   :  { %v2858_v36 = vpop.f32.mrb[2].mxu1 }
  0xf3   :  { %v245_v37 = vadd.f32 %v2858_v36, %v2659_v35  ;;  %v239_v38 = vpop.f32.mrb[3].mxu1 }
  0xf4   :  { %v240_v39 = vadd.f32 %v2659_v35, %v239_v38 }
  0xf5   :  { %249 = vst.msk [vmem:[#allocation3 + $0x8] sm:$0xff] %vm159_vm2, %v245_v37  ;;  %v272_v57 = vld [vmem:[#allocation2] sm:$0x3] }
  0xf6   :  { %248 = vst.msk [vmem:[#allocation3] sm:$0xff] %vm159_vm2, %v240_v39  ;;  %v417_v58 = vadd.f32 %v344_v53, %v272_v57  ;;  %v480_v39 = vld [vmem:[#allocation2 + $0x2] sm:$0x3] }
  0xf8   :  { %v2664_v59 = vmul.f32 -1.442695, %v417_v58 }
  0xfa   :  { %v413_v41 = vpop.f32.mrb[4].mxu1 }
  0xfb   :  { %v414_v42 = vadd.f32 %v3674_v40, %v413_v41  ;;  %v2880_v43 = vpop.f32.mrb[5].mxu1 }
  0xfc   :  { %v273_v44 = vld [vmem:[#allocation3 + $0xe] sm:$0x3]  ;;  %v481_v23 = vld [vmem:[#allocation3 + $0xc] sm:$0x3] }
  0xfd   :  { %443 = vrot.lane.b32.xlu0 %v414_v42, %s3456_s4  ;;  %v424_v45 = vadd.f32 %v414_v42, %v273_v44 }
  0xff   :  { %v2665_v46 = vmul.f32 -1.442695, %v424_v45 }
 0x101   :  { %3275 = vpow2.f32 %v2665_v46 }
 0x10b   :  { %v3276_v47 = vpop.eup %3275 }
 0x10c   :  { %v428_v48 = vadd.f32 1.0, %v3276_v47 }
 0x10e   :  { %3277 = vrcp.f32 %v428_v48 }
 0x118   :  { %v3278_v49 = vpop.eup %3277 }
 0x119   :  { %v461_v62 = vsub.f32 1.0, %v3278_v49  ;;  %v467_v0 = vmul.f32 0.0, %v3278_v49 }
 0x16f   :  { %v444_v50 = vpop.permute.xlu0 %443 }
 0x170   :  { %v446_v51 = vmul.f32 %v3278_v49, %v444_v50 }
 0x172   :  { %448 = vrot.lane.b32.xlu0 %v446_v51, %s3456_s4 }
 0x176   :  { %432 = vrot.lane.b32.xlu0 %v344_v53, %s3456_s4 }
 0x1e4   :  { %v449_v54 = vpop.permute.xlu0 %448 }
 0x1e5   :  { %v451_v55 = vadd.f32 %v449_v54, %v273_v44 }
 0x1e7   :  { %3279 = vtanh.f32 %v451_v55 }
 0x1e8   :  { %3281 = vpow2.f32 %v2664_v59  ;;  %v433_v3 = vpop.permute.xlu0 %432 }
 0x1f1   :  { %v3280_v56 = vpop.eup %3279 }
 0x1f2   :  { %463 = vrot.lane.b32.xlu1 %v3280_v56, %s3457_s30  ;;  %v3282_v60 = vpop.eup %3281 }
 0x1f3   :  { %v421_v61 = vadd.f32 1.0, %v3282_v60 }
 0x1f5   :  { %3283 = vrcp.f32 %v421_v61 }
 0x1ff   :  { %v3284_v4 = vpop.eup %3283 }
 0x200   :  { %v435_v5 = vmul.f32 %v3284_v4, %v433_v3  ;;  %v453_v12 = vsub.f32 1.0, %v3284_v4  ;;  %v459_v15 = vmul.f32 0.0, %v3284_v4  ;;  %v689_v3 = vld [vmem:[#allocation3 + $0xa] sm:$0x3] }
 0x264   :  { %v464_v63 = vpop.permute.xlu1 %463 }
 0x265   :  { %v466_v1 = vmul.f32 %v464_v63, %v461_v62 }
 0x267   :  { %v3687_v2 = vadd.f32 %v467_v0, %v466_v1 }
 0x269   :  { %476 = vrot.lane.b32.xlu1 %v3687_v2, %s3457_s30 }
 0x26d   :  { %437 = vrot.lane.b32.xlu1 %v435_v5, %s3456_s4 }
 0x2db   :  { %v477_v7 = vpop.permute.xlu1 %476 }
 0x2dc   :  { %479 = vst.msk [vmem:[#allocation5 + $0xe] sm:$0x3] %vm473_vm3, %v477_v7  ;;  %2901 = vmatmul.mubr.msk.f32.vlgmr.msra.gmra.mrb[6].mxu1 %vm77_vm0, %v477_v7 }
 0x2dd   :  { %3156 = vmatpush3.bf16.msra.mxu1 %v3638_v24  ;;  %2922 = vmatprep.mubr.msk.f32.mxu1 %vm3454_vm1, %v3455_v11 }
 0x2de   :  { %3157 = vmatprep.subr.bf16.mxu1 %v3453_v6 }
 0x2df   :  { %v438_v8 = vpop.permute.xlu1 %437 }
 0x2e0   :  { %v440_v9 = vadd.f32 %v438_v8, %v272_v57 }
 0x2e1   :  { %3159 = vmatpush3.bf16.msra.mxu1 %v3651_v27 }
 0x2e2   :  { %3285 = vtanh.f32 %v440_v9  ;;  %3166 = vmatprep.subr.bf16.mxu1 %v3453_v6 }
 0x2ec   :  { %v3286_v10 = vpop.eup %3285 }
 0x2ed   :  { %455 = vrot.lane.b32.xlu0 %v3286_v10, %s3457_s30 }
 0x35f   :  { %v456_v14 = vpop.permute.xlu0 %455 }
 0x360   :  { %v458_v16 = vmul.f32 %v456_v14, %v453_v12 }
 0x362   :  { %v3701_v17 = vadd.f32 %v459_v15, %v458_v16 }
 0x364   :  { %470 = vrot.lane.b32.xlu1 %v3701_v17, %s3457_s30 }
 0x3af   :  { %v622_v18 = vpop.f32.mrb[6].mxu1 }
 0x3b0   :  { %v623_v20 = vadd.f32 %v3674_v40, %v622_v18  ;;  %v2902_v21 = vpop.f32.mrb[7].mxu1 }
 0x3b1   :  { %v688_v21 = vld [vmem:[#allocation2 + $0x4] sm:$0x3] }
 0x3b2   :  { %652 = vrot.lane.b32.xlu0 %v623_v20, %s3456_s4  ;;  %v633_v25 = vadd.f32 %v623_v20, %v481_v23 }
 0x3b4   :  { %v2669_v26 = vmul.f32 -1.442695, %v633_v25 }
 0x3b6   :  { %3287 = vpow2.f32 %v2669_v26 }
 0x3c0   :  { %v3288_v28 = vpop.eup %3287 }
 0x3c1   :  { %v637_v29 = vadd.f32 1.0, %v3288_v28 }
 0x3c3   :  { %3289 = vrcp.f32 %v637_v29 }
 0x3cd   :  { %v3290_v30 = vpop.eup %3289 }
 0x3ce   :  { %v670_v45 = vsub.f32 1.0, %v3290_v30  ;;  %v676_v47 = vmul.f32 %v3290_v30, %v3687_v2 }
 0x3d6   :  { %v471_v22 = vpop.permute.xlu1 %470 }
 0x3d7   :  { %474 = vst.msk [vmem:[#allocation4] sm:$0x3] %vm473_vm3, %v471_v22  ;;  %2890 = vmatmul.mubr.msk.f32.vlgmr.msra.gmra.mrb[2].mxu0 %vm77_vm0, %v471_v22 }
 0x3d8   :  { %3150 = vmatpush3.bf16.msra.mxu0 %v3602_v13  ;;  %2911 = vmatprep.mubr.msk.f32.mxu0 %vm3454_vm1, %v3455_v11 }
 0x3d9   :  { %3151 = vmatprep.subr.bf16.mxu0 %v3453_v6 }
 0x3dc   :  { %3153 = vmatpush3.bf16.msra.mxu0 %v3617_v19 }
 0x3dd   :  { %3160 = vmatprep.subr.bf16.mxu0 %v3453_v6 }
 0x424   :  { %v653_v31 = vpop.permute.xlu0 %652 }
 0x425   :  { %v655_v32 = vmul.f32 %v3290_v30, %v653_v31 }
 0x427   :  { %657 = vrot.lane.b32.xlu1 %v655_v32, %s3456_s4 }
 0x499   :  { %v658_v33 = vpop.permute.xlu1 %657 }
 0x49a   :  { %v660_v34 = vadd.f32 %v658_v33, %v481_v23 }
 0x49c   :  { %3291 = vtanh.f32 %v660_v34 }
 0x4a6   :  { %v3292_v35 = vpop.eup %3291 }
 0x4a7   :  { %672 = vrot.lane.b32.xlu0 %v3292_v35, %s3457_s30 }
 0x4aa   :  { %v550_v36 = vpop.f32.mrb[2].mxu0 }
 0x4ab   :  { %v551_v37 = vadd.f32 %v3681_v52, %v550_v36  ;;  %v2891_v38 = vpop.f32.mrb[3].mxu0 }
 0x4ad   :  { %641 = vrot.lane.b32.xlu0 %v551_v37, %s3456_s4  ;;  %v626_v41 = vadd.f32 %v551_v37, %v480_v39 }
 0x4af   :  { %v2668_v42 = vmul.f32 -1.442695, %v626_v41 }
 0x4b1   :  { %3293 = vpow2.f32 %v2668_v42 }
 0x4bb   :  { %v3294_v43 = vpop.eup %3293 }
 0x4bc   :  { %v630_v44 = vadd.f32 1.0, %v3294_v43 }
 0x4be   :  { %3295 = vrcp.f32 %v630_v44 }
 0x4c8   :  { %v3296_v50 = vpop.eup %3295 }
 0x4c9   :  { %v662_v58 = vsub.f32 1.0, %v3296_v50  ;;  %v668_v60 = vmul.f32 %v3296_v50, %v3701_v17 }
 0x519   :  { %v673_v46 = vpop.permute.xlu0 %672 }
 0x51a   :  { %v675_v48 = vmul.f32 %v673_v46, %v670_v45 }
 0x51c   :  { %v3720_v49 = vadd.f32 %v676_v47, %v675_v48 }
 0x51e   :  { %684 = vrot.lane.b32.xlu1 %v3720_v49, %s3457_s30 }
 0x51f   :  { %v642_v51 = vpop.permute.xlu0 %641 }
 0x520   :  { %v644_v53 = vmul.f32 %v3296_v50, %v642_v51  ;;  %v897_v50 = vld [vmem:[#allocation3 + $0x8] sm:$0x3] }
 0x522   :  { %646 = vrot.lane.b32.xlu1 %v644_v53, %s3456_s4 }
 0x590   :  { %v685_v54 = vpop.permute.xlu1 %684 }
 0x591   :  { %687 = vst.msk [vmem:[#allocation5 + $0xc] sm:$0x3] %vm473_vm3, %v685_v54  ;;  %2923 = vmatmul.mubr.msk.f32.vlgmr.msra.gmra.mrb[8].mxu1 %vm77_vm0, %v685_v54 }
 0x592   :  { %3168 = vmatpush3.bf16.msra.mxu1 %v3638_v24  ;;  %2944 = vmatprep.mubr.msk.f32.mxu1 %vm3454_vm1, %v3455_v11 }
 0x593   :  { %3169 = vmatprep.subr.bf16.mxu1 %v3453_v6 }
 0x594   :  { %v647_v55 = vpop.permute.xlu1 %646 }
 0x595   :  { %v649_v56 = vadd.f32 %v647_v55, %v480_v39 }
 0x596   :  { %3171 = vmatpush3.bf16.msra.mxu1 %v3651_v27 }
 0x597   :  { %3297 = vtanh.f32 %v649_v56  ;;  %3178 = vmatprep.subr.bf16.mxu1 %v3453_v6 }
 0x5a1   :  { %v3298_v57 = vpop.eup %3297 }
 0x5a2   :  { %664 = vrot.lane.b32.xlu0 %v3298_v57, %s3457_s30 }
 0x614   :  { %v665_v59 = vpop.permute.xlu0 %664 }
 0x615   :  { %v667_v61 = vmul.f32 %v665_v59, %v662_v58 }
 0x617   :  { %v3735_v62 = vadd.f32 %v668_v60, %v667_v61 }
 0x619   :  { %679 = vrot.lane.b32.xlu1 %v3735_v62, %s3457_s30 }
 0x664   :  { %v830_v63 = vpop.f32.mrb[8].mxu1 }
 0x665   :  { %v831_v0 = vadd.f32 %v3674_v40, %v830_v63  ;;  %v2924_v1 = vpop.f32.mrb[9].mxu1 }
 0x666   :  { %v896_v1 = vld [vmem:[#allocation2 + $0x6] sm:$0x3] }
 0x667   :  { %860 = vrot.lane.b32.xlu0 %v831_v0, %s3456_s4  ;;  %v841_v4 = vadd.f32 %v831_v0, %v689_v3 }
 0x669   :  { %v2673_v5 = vmul.f32 -1.442695, %v841_v4 }
 0x66b   :  { %3299 = vpow2.f32 %v2673_v5 }
 0x675   :  { %v3300_v7 = vpop.eup %3299 }
 0x676   :  { %v845_v8 = vadd.f32 1.0, %v3300_v7 }
 0x678   :  { %3301 = vrcp.f32 %v845_v8 }
 0x682   :  { %v3302_v9 = vpop.eup %3301 }
 0x683   :  { %v878_v28 = vsub.f32 1.0, %v3302_v9  ;;  %v884_v30 = vmul.f32 %v3302_v9, %v3720_v49 }
 0x68b   :  { %v680_v2 = vpop.permute.xlu1 %679 }
 0x68c   :  { %682 = vst.msk [vmem:[#allocation4 + $0x2] sm:$0x3] %vm473_vm3, %v680_v2  ;;  %2912 = vmatmul.mubr.msk.f32.vlgmr.msra.gmra.mrb[4].mxu0 %vm77_vm0, %v680_v2 }
 0x68d   :  { %3162 = vmatpush3.bf16.msra.mxu0 %v3602_v13  ;;  %2933 = vmatprep.mubr.msk.f32.mxu0 %vm3454_vm1, %v3455_v11 }
 0x68e   :  { %3163 = vmatprep.subr.bf16.mxu0 %v3453_v6 }
 0x691   :  { %3165 = vmatpush3.bf16.msra.mxu0 %v3617_v19 }
 0x692   :  { %3172 = vmatprep.subr.bf16.mxu0 %v3453_v6 }
 0x6d9   :  { %v861_v10 = vpop.permute.xlu0 %860 }
 0x6da   :  { %v863_v12 = vmul.f32 %v3302_v9, %v861_v10 }
 0x6dc   :  { %865 = vrot.lane.b32.xlu1 %v863_v12, %s3456_s4 }
 0x74e   :  { %v866_v14 = vpop.permute.xlu1 %865 }
 0x74f   :  { %v868_v15 = vadd.f32 %v866_v14, %v689_v3 }
 0x751   :  { %3303 = vtanh.f32 %v868_v15 }
 0x75b   :  { %v3304_v16 = vpop.eup %3303 }
 0x75c   :  { %880 = vrot.lane.b32.xlu0 %v3304_v16, %s3457_s30 }
 0x75f   :  { %v758_v17 = vpop.f32.mrb[4].mxu0 }
 0x760   :  { %v759_v18 = vadd.f32 %v3681_v52, %v758_v17  ;;  %v2913_v20 = vpop.f32.mrb[5].mxu0 }
 0x762   :  { %849 = vrot.lane.b32.xlu0 %v759_v18, %s3456_s4  ;;  %v834_v22 = vadd.f32 %v759_v18, %v688_v21 }
 0x764   :  { %v2672_v23 = vmul.f32 -1.442695, %v834_v22 }
 0x766   :  { %3305 = vpow2.f32 %v2672_v23 }
 0x770   :  { %v3306_v25 = vpop.eup %3305 }
 0x771   :  { %v838_v26 = vadd.f32 1.0, %v3306_v25 }
 0x773   :  { %3307 = vrcp.f32 %v838_v26 }
 0x77d   :  { %v3308_v33 = vpop.eup %3307 }
 0x77e   :  { %v870_v41 = vsub.f32 1.0, %v3308_v33  ;;  %v876_v43 = vmul.f32 %v3308_v33, %v3735_v62 }
 0x7ce   :  { %v881_v29 = vpop.permute.xlu0 %880 }
 0x7cf   :  { %v883_v31 = vmul.f32 %v881_v29, %v878_v28 }
 0x7d1   :  { %v3754_v32 = vadd.f32 %v884_v30, %v883_v31 }
 0x7d3   :  { %892 = vrot.lane.b32.xlu1 %v3754_v32, %s3457_s30 }
 0x7d4   :  { %v850_v34 = vpop.permute.xlu0 %849 }
 0x7d5   :  { %v852_v35 = vmul.f32 %v3308_v33, %v850_v34  ;;  %v1105_v33 = vld [vmem:[#allocation3 + $0x6] sm:$0x3] }
 0x7d7   :  { %854 = vrot.lane.b32.xlu1 %v852_v35, %s3456_s4 }
 0x845   :  { %v893_v36 = vpop.permute.xlu1 %892 }
 0x846   :  { %895 = vst.msk [vmem:[#allocation5 + $0xa] sm:$0x3] %vm473_vm3, %v893_v36  ;;  %2945 = vmatmul.mubr.msk.f32.vlgmr.msra.gmra.mrb[10].mxu1 %vm77_vm0, %v893_v36 }
 0x847   :  { %3180 = vmatpush3.bf16.msra.mxu1 %v3638_v24  ;;  %2966 = vmatprep.mubr.msk.f32.mxu1 %vm3454_vm1, %v3455_v11 }
 0x848   :  { %3181 = vmatprep.subr.bf16.mxu1 %v3453_v6 }
 0x849   :  { %v855_v37 = vpop.permute.xlu1 %854 }
 0x84a   :  { %v857_v38 = vadd.f32 %v855_v37, %v688_v21 }
 0x84b   :  { %3183 = vmatpush3.bf16.msra.mxu1 %v3651_v27 }
 0x84c   :  { %3309 = vtanh.f32 %v857_v38  ;;  %3190 = vmatprep.subr.bf16.mxu1 %v3453_v6 }
 0x856   :  { %v3310_v39 = vpop.eup %3309 }
 0x857   :  { %872 = vrot.lane.b32.xlu0 %v3310_v39, %s3457_s30 }
 0x8c9   :  { %v873_v42 = vpop.permute.xlu0 %872 }
 0x8ca   :  { %v875_v44 = vmul.f32 %v873_v42, %v870_v41 }
 0x8cc   :  { %v3769_v45 = vadd.f32 %v876_v43, %v875_v44 }
 0x8ce   :  { %887 = vrot.lane.b32.xlu1 %v3769_v45, %s3457_s30 }
 0x919   :  { %v1038_v46 = vpop.f32.mrb[10].mxu1 }
 0x91a   :  { %v1039_v47 = vadd.f32 %v3674_v40, %v1038_v46  ;;  %v2946_v48 = vpop.f32.mrb[11].mxu1 }
 0x91b   :  { %v1104_v48 = vld [vmem:[#allocation2 + $0x8] sm:$0x3] }
 0x91c   :  { %1068 = vrot.lane.b32.xlu0 %v1039_v47, %s3456_s4  ;;  %v1049_v51 = vadd.f32 %v1039_v47, %v897_v50 }
 0x91e   :  { %v2677_v53 = vmul.f32 -1.442695, %v1049_v51 }
 0x920   :  { %3311 = vpow2.f32 %v2677_v53 }
 0x92a   :  { %v3312_v54 = vpop.eup %3311 }
 0x92b   :  { %v1053_v55 = vadd.f32 1.0, %v3312_v54 }
 0x92d   :  { %3313 = vrcp.f32 %v1053_v55 }
 0x937   :  { %v3314_v56 = vpop.eup %3313 }
 0x938   :  { %v1086_v7 = vsub.f32 1.0, %v3314_v56  ;;  %v1092_v9 = vmul.f32 %v3314_v56, %v3754_v32 }
 0x940   :  { %v888_v49 = vpop.permute.xlu1 %887 }
 0x941   :  { %890 = vst.msk [vmem:[#allocation4 + $0x4] sm:$0x3] %vm473_vm3, %v888_v49  ;;  %2934 = vmatmul.mubr.msk.f32.vlgmr.msra.gmra.mrb[6].mxu0 %vm77_vm0, %v888_v49 }
 0x942   :  { %3174 = vmatpush3.bf16.msra.mxu0 %v3602_v13  ;;  %2955 = vmatprep.mubr.msk.f32.mxu0 %vm3454_vm1, %v3455_v11 }
 0x943   :  { %3175 = vmatprep.subr.bf16.mxu0 %v3453_v6 }
 0x946   :  { %3177 = vmatpush3.bf16.msra.mxu0 %v3617_v19 }
 0x947   :  { %3184 = vmatprep.subr.bf16.mxu0 %v3453_v6 }
 0x98e   :  { %v1069_v57 = vpop.permute.xlu0 %1068 }
 0x98f   :  { %v1071_v58 = vmul.f32 %v3314_v56, %v1069_v57 }
 0x991   :  { %1073 = vrot.lane.b32.xlu1 %v1071_v58, %s3456_s4 }
 0xa03   :  { %v1074_v59 = vpop.permute.xlu1 %1073 }
 0xa04   :  { %v1076_v60 = vadd.f32 %v1074_v59, %v897_v50 }
 0xa06   :  { %3315 = vtanh.f32 %v1076_v60 }
 0xa10   :  { %v3316_v61 = vpop.eup %3315 }
 0xa11   :  { %1088 = vrot.lane.b32.xlu0 %v3316_v61, %s3457_s30 }
 0xa14   :  { %v966_v62 = vpop.f32.mrb[6].mxu0 }
 0xa15   :  { %v967_v63 = vadd.f32 %v3681_v52, %v966_v62  ;;  %v2935_v0 = vpop.f32.mrb[7].mxu0 }
 0xa17   :  { %1057 = vrot.lane.b32.xlu0 %v967_v63, %s3456_s4  ;;  %v1042_v2 = vadd.f32 %v967_v63, %v896_v1 }
 0xa19   :  { %v2676_v3 = vmul.f32 -1.442695, %v1042_v2 }
 0xa1b   :  { %3317 = vpow2.f32 %v2676_v3 }
 0xa25   :  { %v3318_v4 = vpop.eup %3317 }
 0xa26   :  { %v1046_v5 = vadd.f32 1.0, %v3318_v4 }
 0xa28   :  { %3319 = vrcp.f32 %v1046_v5 }
 0xa32   :  { %v3320_v14 = vpop.eup %3319 }
 0xa33   :  { %v1078_v22 = vsub.f32 1.0, %v3320_v14  ;;  %v1084_v25 = vmul.f32 %v3320_v14, %v3769_v45 }
 0xa83   :  { %v1089_v8 = vpop.permute.xlu0 %1088 }
 0xa84   :  { %v1091_v10 = vmul.f32 %v1089_v8, %v1086_v7 }
 0xa86   :  { %v3788_v12 = vadd.f32 %v1092_v9, %v1091_v10 }
 0xa88   :  { %1100 = vrot.lane.b32.xlu1 %v3788_v12, %s3457_s30 }
 0xa89   :  { %v1058_v15 = vpop.permute.xlu0 %1057 }
 0xa8a   :  { %v1060_v16 = vmul.f32 %v3320_v14, %v1058_v15  ;;  %v1313_v14 = vld [vmem:[#allocation3 + $0x4] sm:$0x3] }
 0xa8c   :  { %1062 = vrot.lane.b32.xlu1 %v1060_v16, %s3456_s4 }
 0xafa   :  { %v1101_v17 = vpop.permute.xlu1 %1100 }
 0xafb   :  { %1103 = vst.msk [vmem:[#allocation5 + $0x8] sm:$0x3] %vm473_vm3, %v1101_v17  ;;  %2967 = vmatmul.mubr.msk.f32.vlgmr.msra.gmra.mrb[12].mxu1 %vm77_vm0, %v1101_v17 }
 0xafc   :  { %3192 = vmatpush3.bf16.msra.mxu1 %v3638_v24  ;;  %2988 = vmatprep.mubr.msk.f32.mxu1 %vm3454_vm1, %v3455_v11 }
 0xafd   :  { %3193 = vmatprep.subr.bf16.mxu1 %v3453_v6 }
 0xafe   :  { %v1063_v18 = vpop.permute.xlu1 %1062 }
 0xaff   :  { %v1065_v20 = vadd.f32 %v1063_v18, %v896_v1 }
 0xb00   :  { %3195 = vmatpush3.bf16.msra.mxu1 %v3651_v27 }
 0xb01   :  { %3321 = vtanh.f32 %v1065_v20  ;;  %3202 = vmatprep.subr.bf16.mxu1 %v3453_v6 }
 0xb0b   :  { %v3322_v21 = vpop.eup %3321 }
 0xb0c   :  { %1080 = vrot.lane.b32.xlu0 %v3322_v21, %s3457_s30 }
 0xb7e   :  { %v1081_v23 = vpop.permute.xlu0 %1080 }
 0xb7f   :  { %v1083_v26 = vmul.f32 %v1081_v23, %v1078_v22 }
 0xb81   :  { %v3803_v28 = vadd.f32 %v1084_v25, %v1083_v26 }
 0xb83   :  { %1095 = vrot.lane.b32.xlu1 %v3803_v28, %s3457_s30 }
 0xbce   :  { %v1246_v29 = vpop.f32.mrb[12].mxu1 }
 0xbcf   :  { %v1247_v30 = vadd.f32 %v3674_v40, %v1246_v29  ;;  %v2968_v31 = vpop.f32.mrb[13].mxu1 }
 0xbd0   :  { %v1312_v31 = vld [vmem:[#allocation2 + $0xa] sm:$0x3] }
 0xbd1   :  { %1276 = vrot.lane.b32.xlu0 %v1247_v30, %s3456_s4  ;;  %v1257_v34 = vadd.f32 %v1247_v30, %v1105_v33 }
 0xbd3   :  { %v2681_v35 = vmul.f32 -1.442695, %v1257_v34 }
 0xbd5   :  { %3323 = vpow2.f32 %v2681_v35 }
 0xbdf   :  { %v3324_v36 = vpop.eup %3323 }
 0xbe0   :  { %v1261_v37 = vadd.f32 1.0, %v3324_v36 }
 0xbe2   :  { %3325 = vrcp.f32 %v1261_v37 }
 0xbec   :  { %v3326_v38 = vpop.eup %3325 }
 0xbed   :  { %v1294_v54 = vsub.f32 1.0, %v3326_v38  ;;  %v1300_v56 = vmul.f32 %v3326_v38, %v3788_v12 }
 0xbf5   :  { %v1096_v32 = vpop.permute.xlu1 %1095 }
 0xbf6   :  { %1098 = vst.msk [vmem:[#allocation4 + $0x6] sm:$0x3] %vm473_vm3, %v1096_v32  ;;  %2956 = vmatmul.mubr.msk.f32.vlgmr.msra.gmra.mrb[8].mxu0 %vm77_vm0, %v1096_v32 }
 0xbf7   :  { %3186 = vmatpush3.bf16.msra.mxu0 %v3602_v13  ;;  %2977 = vmatprep.mubr.msk.f32.mxu0 %vm3454_vm1, %v3455_v11 }
 0xbf8   :  { %3187 = vmatprep.subr.bf16.mxu0 %v3453_v6 }
 0xbfb   :  { %3189 = vmatpush3.bf16.msra.mxu0 %v3617_v19 }
 0xbfc   :  { %3196 = vmatprep.subr.bf16.mxu0 %v3453_v6 }
 0xc43   :  { %v1277_v39 = vpop.permute.xlu0 %1276 }
 0xc44   :  { %v1279_v41 = vmul.f32 %v3326_v38, %v1277_v39 }
 0xc46   :  { %1281 = vrot.lane.b32.xlu1 %v1279_v41, %s3456_s4 }
 0xcb8   :  { %v1282_v42 = vpop.permute.xlu1 %1281 }
 0xcb9   :  { %v1284_v43 = vadd.f32 %v1282_v42, %v1105_v33 }
 0xcbb   :  { %3327 = vtanh.f32 %v1284_v43 }
 0xcc5   :  { %v3328_v44 = vpop.eup %3327 }
 0xcc6   :  { %1296 = vrot.lane.b32.xlu0 %v3328_v44, %s3457_s30 }
 0xcc9   :  { %v1174_v45 = vpop.f32.mrb[8].mxu0 }
 0xcca   :  { %v1175_v46 = vadd.f32 %v3681_v52, %v1174_v45  ;;  %v2957_v47 = vpop.f32.mrb[9].mxu0 }
 0xccc   :  { %1265 = vrot.lane.b32.xlu0 %v1175_v46, %s3456_s4  ;;  %v1250_v49 = vadd.f32 %v1175_v46, %v1104_v48 }
 0xcce   :  { %v2680_v50 = vmul.f32 -1.442695, %v1250_v49 }
 0xcd0   :  { %3329 = vpow2.f32 %v2680_v50 }
 0xcda   :  { %v3330_v51 = vpop.eup %3329 }
 0xcdb   :  { %v1254_v53 = vadd.f32 1.0, %v3330_v51 }
 0xcdd   :  { %3331 = vrcp.f32 %v1254_v53 }
 0xce7   :  { %v3332_v59 = vpop.eup %3331 }
 0xce8   :  { %v1286_v2 = vsub.f32 1.0, %v3332_v59  ;;  %v1292_v4 = vmul.f32 %v3332_v59, %v3803_v28 }
 0xd38   :  { %v1297_v55 = vpop.permute.xlu0 %1296 }
 0xd39   :  { %v1299_v57 = vmul.f32 %v1297_v55, %v1294_v54 }
 0xd3b   :  { %v3822_v58 = vadd.f32 %v1300_v56, %v1299_v57 }
 0xd3d   :  { %1308 = vrot.lane.b32.xlu1 %v3822_v58, %s3457_s30 }
 0xd3e   :  { %v1266_v60 = vpop.permute.xlu0 %1265 }
 0xd3f   :  { %v1268_v61 = vmul.f32 %v3332_v59, %v1266_v60 }
 0xd41   :  { %1270 = vrot.lane.b32.xlu1 %v1268_v61, %s3456_s4 }
 0xdaf   :  { %v1309_v62 = vpop.permute.xlu1 %1308 }
 0xdb0   :  { %1311 = vst.msk [vmem:[#allocation5 + $0x6] sm:$0x3] %vm473_vm3, %v1309_v62  ;;  %2989 = vmatmul.mubr.msk.f32.vlgmr.msra.gmra.mrb[14].mxu1 %vm77_vm0, %v1309_v62 }
 0xdb1   :  { %3204 = vmatpush3.bf16.msra.mxu1 %v3638_v24  ;;  %3010 = vmatprep.mubr.msk.f32.mxu1 %vm3454_vm1, %v3455_v11 }
 0xdb2   :  { %3205 = vmatprep.subr.bf16.mxu1 %v3453_v6 }
 0xdb3   :  { %v1271_v63 = vpop.permute.xlu1 %1270 }
 0xdb4   :  { %v1273_v0 = vadd.f32 %v1271_v63, %v1104_v48 }
 0xdb5   :  { %3207 = vmatpush3.bf16.msra.mxu1 %v3651_v27 }
 0xdb6   :  { %3333 = vtanh.f32 %v1273_v0  ;;  %3214 = vmatprep.subr.bf16.mxu1 %v3453_v6 }
 0xdc0   :  { %v3334_v1 = vpop.eup %3333 }
 0xdc1   :  { %1288 = vrot.lane.b32.xlu0 %v3334_v1, %s3457_s30 }
 0xe33   :  { %v1289_v3 = vpop.permute.xlu0 %1288 }
 0xe34   :  { %v1291_v5 = vmul.f32 %v1289_v3, %v1286_v2 }
 0xe36   :  { %v3837_v7 = vadd.f32 %v1292_v4, %v1291_v5  ;;  %v1520_v5 = vld [vmem:[#allocation2 + $0xc] sm:$0x3] }
 0xe38   :  { %1303 = vrot.lane.b32.xlu1 %v3837_v7, %s3457_s30 }
 0xe83   :  { %v1454_v8 = vpop.f32.mrb[14].mxu1 }
 0xe84   :  { %v1455_v9 = vadd.f32 %v3674_v40, %v1454_v8  ;;  %v2990_v10 = vpop.f32.mrb[15].mxu1 }
 0xe86   :  { %1484 = vrot.lane.b32.xlu0 %v1455_v9, %s3456_s4  ;;  %v1465_v15 = vadd.f32 %v1455_v9, %v1313_v14 }
 0xe88   :  { %v2685_v16 = vmul.f32 -1.442695, %v1465_v15 }
 0xe8a   :  { %3335 = vpow2.f32 %v2685_v16 }
 0xe94   :  { %v3336_v17 = vpop.eup %3335 }
 0xe95   :  { %v1469_v18 = vadd.f32 1.0, %v3336_v17 }
 0xe97   :  { %3337 = vrcp.f32 %v1469_v18 }
 0xea1   :  { %v3338_v20 = vpop.eup %3337 }
 0xea2   :  { %v1502_v36 = vsub.f32 1.0, %v3338_v20  ;;  %v1508_v38 = vmul.f32 %v3338_v20, %v3822_v58 }
 0xeaa   :  { %v1304_v12 = vpop.permute.xlu1 %1303 }
 0xeab   :  { %1306 = vst.msk [vmem:[#allocation4 + $0x8] sm:$0x3] %vm473_vm3, %v1304_v12  ;;  %2978 = vmatmul.mubr.msk.f32.vlgmr.msra.gmra.mrb[10].mxu0 %vm77_vm0, %v1304_v12 }
 0xeac   :  { %3198 = vmatpush3.bf16.msra.mxu0 %v3602_v13  ;;  %2999 = vmatprep.mubr.msk.f32.mxu0 %vm3454_vm1, %v3455_v11 }
 0xead   :  { %3199 = vmatprep.subr.bf16.mxu0 %v3453_v6 }
 0xeb0   :  { %3201 = vmatpush3.bf16.msra.mxu0 %v3617_v19 }
 0xeb1   :  { %3208 = vmatprep.subr.bf16.mxu0 %v3453_v6 }
 0xef8   :  { %v1485_v21 = vpop.permute.xlu0 %1484 }
 0xef9   :  { %v1487_v22 = vmul.f32 %v3338_v20, %v1485_v21 }
 0xefb   :  { %1489 = vrot.lane.b32.xlu1 %v1487_v22, %s3456_s4 }
 0xf6d   :  { %v1490_v23 = vpop.permute.xlu1 %1489 }
 0xf6e   :  { %v1492_v25 = vadd.f32 %v1490_v23, %v1313_v14 }
 0xf70   :  { %3339 = vtanh.f32 %v1492_v25 }
 0xf7a   :  { %v3340_v26 = vpop.eup %3339 }
 0xf7b   :  { %1504 = vrot.lane.b32.xlu0 %v3340_v26, %s3457_s30 }
 0xf7e   :  { %v1382_v28 = vpop.f32.mrb[10].mxu0 }
 0xf7f   :  { %v1383_v29 = vadd.f32 %v3681_v52, %v1382_v28  ;;  %v2979_v30 = vpop.f32.mrb[11].mxu0 }
 0xf81   :  { %1473 = vrot.lane.b32.xlu0 %v1383_v29, %s3456_s4  ;;  %v1458_v32 = vadd.f32 %v1383_v29, %v1312_v31 }
 0xf83   :  { %v2684_v33 = vmul.f32 -1.442695, %v1458_v32 }
 0xf85   :  { %3341 = vpow2.f32 %v2684_v33 }
 0xf8f   :  { %v3342_v34 = vpop.eup %3341 }
 0xf90   :  { %v1462_v35 = vadd.f32 1.0, %v3342_v34 }
 0xf92   :  { %3343 = vrcp.f32 %v1462_v35 }
 0xf9c   :  { %v3344_v42 = vpop.eup %3343 }
 0xf9d   :  { %v1494_v49 = vsub.f32 1.0, %v3344_v42  ;;  %v1500_v51 = vmul.f32 %v3344_v42, %v3837_v7 }
 0xfed   :  { %v1505_v37 = vpop.permute.xlu0 %1504 }
 0xfee   :  { %v1507_v39 = vmul.f32 %v1505_v37, %v1502_v36  ;;  %v1729_v37 = vld [vmem:[#allocation3] sm:$0x3] }
 0xff0   :  { %v3856_v41 = vadd.f32 %v1508_v38, %v1507_v39 }
 0xff2   :  { %1516 = vrot.lane.b32.xlu1 %v3856_v41, %s3457_s30 }
 0xff3   :  { %v1474_v43 = vpop.permute.xlu0 %1473 }
 0xff4   :  { %v1476_v44 = vmul.f32 %v3344_v42, %v1474_v43 }
 0xff6   :  { %1478 = vrot.lane.b32.xlu1 %v1476_v44, %s3456_s4 }
0x1064   :  { %v1517_v45 = vpop.permute.xlu1 %1516 }
0x1065   :  { %1519 = vst.msk [vmem:[#allocation5 + $0x4] sm:$0x3] %vm473_vm3, %v1517_v45  ;;  %3011 = vmatmul.mubr.msk.f32.vlgmr.msra.gmra.mrb[16].mxu1 %vm77_vm0, %v1517_v45 }
0x1066   :  { %3216 = vmatpush3.bf16.msra.mxu1 %v3638_v24  ;;  %3032 = vmatprep.mubr.msk.f32.mxu1 %vm3454_vm1, %v3455_v11 }
0x1067   :  { %3217 = vmatprep.subr.bf16.mxu1 %v3453_v6 }
0x1068   :  { %v1479_v46 = vpop.permute.xlu1 %1478 }
0x1069   :  { %v1481_v47 = vadd.f32 %v1479_v46, %v1312_v31 }
0x106a   :  { %3219 = vmatpush3.bf16.msra.mxu1 %v3651_v27  ;;  %v1521_v27 = vld [vmem:[#allocation3 + $0x2] sm:$0x3] }
0x106b   :  { %3345 = vtanh.f32 %v1481_v47  ;;  %v1958_v47 = vld [vmem:[%s4104_s12] sm:$0xff] }
0x1075   :  { %v3346_v48 = vpop.eup %3345 }
0x1076   :  { %1496 = vrot.lane.b32.xlu0 %v3346_v48, %s3457_s30  ;;  %v1959_v48 = vld [vmem:[%s4104_s12 + $0x8] sm:$0xff] }
0x10e8   :  { %v1497_v50 = vpop.permute.xlu0 %1496 }
0x10e9   :  { %v1499_v53 = vmul.f32 %v1497_v50, %v1494_v49  ;;  %v1960_v49 = vld [vmem:[%s4104_s12 + $0x10] sm:$0xff]  ;;  %v3221_v50 = vpack.c.bf16 %v1959_v48, %v1958_v47 }
0x10eb   :  { %v1501_v54 = vadd.f32 %v1500_v51, %v1499_v53  ;;  %v1961_v51 = vld [vmem:[%s4104_s12 + $0x18] sm:$0xff]  ;;  %s3458_s12 = smov 32  }
0x10ec   :  { %v3224_v53 = vpack.c.bf16 %v1961_v51, %v1960_v49 }
0x10ed   :  { %1511 = vrot.lane.b32.xlu1 %v1501_v54, %s3457_s30 }
0x1138   :  { %v1662_v24 = vpop.f32.mrb[16].mxu1 }
0x1139   :  { %v1663_v55 = vadd.f32 %v3674_v40, %v1662_v24  ;;  %v3012_v56 = vpop.f32.mrb[17].mxu1 }
0x113b   :  { %1692 = vrot.lane.b32.xlu0 %v1663_v55, %s3456_s4  ;;  %v1673_v58 = vadd.f32 %v1663_v55, %v1521_v27 }
0x113d   :  { %v2689_v59 = vmul.f32 -1.442695, %v1673_v58 }
0x113f   :  { %3347 = vpow2.f32 %v2689_v59 }
0x1149   :  { %v3348_v60 = vpop.eup %3347 }
0x114a   :  { %v1677_v61 = vadd.f32 1.0, %v3348_v60 }
0x114c   :  { %3349 = vrcp.f32 %v1677_v61 }
0x1156   :  { %v3350_v62 = vpop.eup %3349 }
0x1157   :  { %v1710_v12 = vsub.f32 1.0, %v3350_v62  ;;  %v1716_v15 = vmul.f32 %v3350_v62, %v3856_v41 }
0x115f   :  { %v1512_v57 = vpop.permute.xlu1 %1511 }
0x1160   :  { %1514 = vst.msk [vmem:[#allocation4 + $0xa] sm:$0x3] %vm473_vm3, %v1512_v57  ;;  %3000 = vmatmul.mubr.msk.f32.vlgmr.msra.gmra.mrb[12].mxu0 %vm77_vm0, %v1512_v57  ;;  %v1728_v57 = vld [vmem:[#allocation2 + $0xe] sm:$0x3] }
0x1161   :  { %3210 = vmatpush3.bf16.msra.mxu0 %v3602_v13  ;;  %3021 = vmatprep.mubr.msk.f32.mxu0 %vm3454_vm1, %v3455_v11 }
0x1162   :  { %3211 = vmatprep.subr.bf16.mxu0 %v3453_v6 }
0x1165   :  { %3213 = vmatpush3.bf16.msra.mxu0 %v3617_v19 }
0x1166   :  { %3220 = vmatprep.subr.bf16.mxu0 %v3453_v6 }
0x11ad   :  { %v1693_v63 = vpop.permute.xlu0 %1692 }
0x11ae   :  { %v1695_v0 = vmul.f32 %v3350_v62, %v1693_v63 }
0x11b0   :  { %1697 = vrot.lane.b32.xlu1 %v1695_v0, %s3456_s4 }
0x1222   :  { %v1698_v13 = vpop.permute.xlu1 %1697 }
0x1223   :  { %v1700_v1 = vadd.f32 %v1698_v13, %v1521_v27 }
0x1225   :  { %3351 = vtanh.f32 %v1700_v1 }
0x122f   :  { %v3352_v2 = vpop.eup %3351 }
0x1230   :  { %1712 = vrot.lane.b32.xlu0 %v3352_v2, %s3457_s30 }
0x1233   :  { %v1590_v19 = vpop.f32.mrb[12].mxu0 }
0x1234   :  { %v1591_v3 = vadd.f32 %v3681_v52, %v1590_v19  ;;  %v3001_v4 = vpop.f32.mrb[13].mxu0 }
0x1236   :  { %1681 = vrot.lane.b32.xlu0 %v1591_v3, %s3456_s4  ;;  %v1666_v7 = vadd.f32 %v1591_v3, %v1520_v5 }
0x1238   :  { %v2688_v8 = vmul.f32 -1.442695, %v1666_v7 }
0x123a   :  { %3353 = vpow2.f32 %v2688_v8  ;;  %v3935_v8 = vld [vmem:[%s4124_s2] sm:$0xff] }
0x1244   :  { %v3354_v9 = vpop.eup %3353 }
0x1245   :  { %v1670_v10 = vadd.f32 1.0, %v3354_v9 }
0x1247   :  { %3355 = vrcp.f32 %v1670_v10 }
0x1251   :  { %v3356_v18 = vpop.eup %3355 }
0x1252   :  { %v1702_v28 = vsub.f32 1.0, %v3356_v18  ;;  %v1708_v30 = vmul.f32 %v3356_v18, %v1501_v54 }
0x12a2   :  { %v1713_v14 = vpop.permute.xlu0 %1712 }
0x12a3   :  { %v1715_v16 = vmul.f32 %v1713_v14, %v1710_v12 }
0x12a5   :  { %v3886_v17 = vadd.f32 %v1716_v15, %v1715_v16  ;;  %v1947_v16 = vld [vmem:[#allocation5 + $0x8] sm:$0xff] }
0x12a7   :  { %1724 = vrot.lane.b32.xlu1 %v3886_v17, %s3457_s30 }
0x12a8   :  { %v1682_v20 = vpop.permute.xlu0 %1681 }
0x12a9   :  { %v1684_v21 = vmul.f32 %v3356_v18, %v1682_v20  ;;  %v2127_v18 = vld [vmem:[%s4105_s13] sm:$0xff]  ;;  %v2128_v20 = vld [vmem:[%s4105_s13 + $0x8] sm:$0xff] }
0x12ab   :  { %1686 = vrot.lane.b32.xlu1 %v1684_v21, %s3456_s4 }
0x1319   :  { %v1725_v22 = vpop.permute.xlu1 %1724 }
0x131a   :  { %1727 = vst.msk [vmem:[#allocation5 + $0x2] sm:$0x3] %vm473_vm3, %v1725_v22  ;;  %3033 = vmatmul.mubr.msk.f32.vlgmr.msra.gmra.mrb[18].mxu1 %vm77_vm0, %v1725_v22  ;;  %v2129_v22 = vld [vmem:[%s4105_s13 + $0x10] sm:$0xff] }
0x131b   :  { %3048 = vmatprep.mubr.msk.f32.mxu1 %vm2041_vm4, %v3935_v8 }
0x131d   :  { %v1687_v23 = vpop.permute.xlu1 %1686 }
0x131e   :  { %v1689_v25 = vadd.f32 %v1687_v23, %v1520_v5  ;;  %v2130_v23 = vld [vmem:[%s4105_s13 + $0x18] sm:$0xff] }
0x1320   :  { %3357 = vtanh.f32 %v1689_v25 }
0x132a   :  { %v3358_v26 = vpop.eup %3357 }
0x132b   :  { %1704 = vrot.lane.b32.xlu0 %v3358_v26, %s3457_s30 }
0x139d   :  { %v1705_v29 = vpop.permute.xlu0 %1704 }
0x139e   :  { %v1707_v31 = vmul.f32 %v1705_v29, %v1702_v28  ;;  %v3226_v28 = vpack.c.bf16 %v2128_v20, %v2127_v18 }
0x13a0   :  { %v3894_v32 = vadd.f32 %v1708_v30, %v1707_v31  ;;  %v3960_v30 = vld [vmem:[%s4124_s2 + $0x8] sm:$0xff]  ;;  %v3230_v31 = vpack.c.bf16 %v2130_v23, %v2129_v22 }
0x13a2   :  { %1719 = vrot.lane.b32.xlu1 %v3894_v32, %s3457_s30 }
0x13ed   :  { %v1870_v33 = vpop.f32.mrb[18].mxu1 }
0x13ee   :  { %v1871_v34 = vadd.f32 %v3674_v40, %v1870_v33  ;;  %v3034_v35 = vpop.f32.mrb[19].mxu1  ;;  %v2131_v33 = vld [vmem:[%s4105_s13 + $0x20] sm:$0xff] }
0x13f0   :  { %1900 = vrot.lane.b32.xlu0 %v1871_v34, %s3456_s4  ;;  %v1881_v38 = vadd.f32 %v1871_v34, %v1729_v37  ;;  %v2132_v34 = vld [vmem:[%s4105_s13 + $0x28] sm:$0xff] }
0x13f2   :  { %v2693_v39 = vmul.f32 -1.442695, %v1881_v38  ;;  %v2134_v38 = vld [vmem:[%s4105_s13 + $0x38] sm:$0xff] }
0x13f4   :  { %3359 = vpow2.f32 %v2693_v39 }
0x13fe   :  { %v3360_v41 = vpop.eup %3359 }
0x13ff   :  { %v1885_v42 = vadd.f32 1.0, %v3360_v41 }
0x1401   :  { %3361 = vrcp.f32 %v1885_v42 }
0x140b   :  { %v3362_v43 = vpop.eup %3361 }
0x140c   :  { %v1918_v61 = vsub.f32 1.0, %v3362_v43  ;;  %v1924_v63 = vmul.f32 %v3362_v43, %v3886_v17  ;;  %v2694_v17 = vld [vmem:[%s4106_s14] ss:$0 sm:$0xff] }
0x1414   :  { %v1720_v36 = vpop.permute.xlu1 %1719 }
0x1415   :  { %1722 = vst.msk [vmem:[#allocation4 + $0xc] sm:$0x3] %vm473_vm3, %v1720_v36  ;;  %3022 = vmatmul.mubr.msk.f32.vlgmr.msra.gmra.mrb[14].mxu0 %vm77_vm0, %v1720_v36  ;;  %v3234_v36 = vpack.c.bf16 %v2132_v34, %v2131_v33  ;;  %v2510_v34 = vld [vmem:[%s4108_s16 + $0x10] sm:$0xff] }
0x1416   :  { %3043 = vmatprep.mubr.msk.f32.mxu0 %vm3454_vm1, %v3455_v11  ;;  %3222 = vmatpush3.bf16.msra.mxu0 %v3221_v50 }
0x1417   :  { %3223 = vmatprep.subr.bf16.mxu0 %v3453_v6 }
0x141a   :  { %3225 = vmatpush3.bf16.msra.mxu0 %v3224_v53 }
0x141b   :  { %3242 = vmatprep.subr.bf16.mxu0 %v3453_v6 }
0x1462   :  { %v1901_v40 = vpop.permute.xlu0 %1900 }
0x1463   :  { %v1903_v44 = vmul.f32 %v3362_v43, %v1901_v40 }
0x1465   :  { %1905 = vrot.lane.b32.xlu1 %v1903_v44, %s3456_s4 }
0x14d7   :  { %v1906_v45 = vpop.permute.xlu1 %1905 }
0x14d8   :  { %v1908_v46 = vadd.f32 %v1906_v45, %v1729_v37  ;;  %v2133_v37 = vld [vmem:[%s4105_s13 + $0x30] sm:$0xff] }
0x14d9   :  { %v3238_v39 = vpack.c.bf16 %v2134_v38, %v2133_v37  ;;  %v2512_v37 = vld [vmem:[%s4108_s16 + $0x20] sm:$0xff]  ;;  %v2513_v38 = vld [vmem:[%s4108_s16 + $0x28] sm:$0xff] }
0x14da   :  { %3363 = vtanh.f32 %v1908_v46  ;;  %v2701_v46 = vld [vmem:[%s4107_s15] ss:$0 sm:$0xff] }
0x14e4   :  { %v3364_v54 = vpop.eup %3363 }
0x14e5   :  { %1920 = vrot.lane.b32.xlu0 %v3364_v54, %s3457_s30  ;;  %v1943_v54 = vld [vmem:[%s4125_s25 + $0x8] sm:$0xff] }
0x14e8   :  { %v1798_v24 = vpop.f32.mrb[14].mxu0 }
0x14e9   :  { %v1799_v55 = vadd.f32 %v3681_v52, %v1798_v24  ;;  %v3023_v56 = vpop.f32.mrb[15].mxu0  ;;  %v1942_v24 = vld [vmem:[%s4125_s25] sm:$0xff] }
0x14eb   :  { %1889 = vrot.lane.b32.xlu0 %v1799_v55, %s3456_s4  ;;  %v1874_v27 = vadd.f32 %v1799_v55, %v1728_v57 }
0x14ed   :  { %v2692_v58 = vmul.f32 -1.442695, %v1874_v27 }
0x14ef   :  { %3365 = vpow2.f32 %v2692_v58 }
0x14f9   :  { %v3366_v59 = vpop.eup %3365 }
0x14fa   :  { %v1878_v60 = vadd.f32 1.0, %v3366_v59  ;;  %v1941_v59 = vld [vmem:[%s4126_s27] sm:$0x3] }
0x14fc   :  { %3367 = vrcp.f32 %v1878_v60 }
0x1506   :  { %v3368_v1 = vpop.eup %3367 }
0x1507   :  { %v1910_v9 = vsub.f32 1.0, %v3368_v1  ;;  %v1916_v12 = vmul.f32 %v3368_v1, %v3894_v32  ;;  %v1944_v32 = vld [vmem:[#allocation4] sm:$0xff] }
0x1557   :  { %v1921_v62 = vpop.permute.xlu0 %1920 }
0x1558   :  { %v1923_v0 = vmul.f32 %v1921_v62, %v1918_v61 }
0x155a   :  { %v1925_v13 = vadd.f32 %v1924_v63, %v1923_v0 }
0x155c   :  { %1932 = vrot.lane.b32.xlu1 %v1925_v13, %s3457_s30 }
0x155d   :  { %v1890_v52 = vpop.permute.xlu0 %1889 }
0x155e   :  { %v1892_v2 = vmul.f32 %v3368_v1, %v1890_v52 }
0x1560   :  { %1894 = vrot.lane.b32.xlu1 %v1892_v2, %s3456_s4 }
0x15ce   :  { %v1933_v19 = vpop.permute.xlu1 %1932 }
0x15cf   :  { %1935 = vst.msk [vmem:[#allocation5] sm:$0x3] %vm473_vm3, %v1933_v19  ;;  %1938 = vst.msk [vmem:[#allocation8 + $0x2] sm:$0x3] %vm473_vm3, %v1933_v19  ;;  %3044 = vmatmul.mubr.msk.f32.vlgmr.msra.gmra.mrb[16].mxu0 %vm77_vm0, %v1933_v19  ;;  %v3459_v19 = vmov 1966171168  }
0x15d0   :  { %3074 = vmatprep.mubr.msk.f32.mxu0 %vm3454_vm1, %v3455_v11 }
0x15d2   :  { %v1895_v3 = vpop.permute.xlu1 %1894 }
0x15d3   :  { %v1897_v4 = vadd.f32 %v1895_v3, %v1728_v57  ;;  %v2324_v3 = vunpack.c.l.s4 %v3459_v19 }
0x15d5   :  { %3369 = vtanh.f32 %v1897_v4  ;;  %v2326_v4 = vlaneseq }
0x15d6   :  { %v1946_v7 = vld [vmem:[#allocation5] sm:$0xff] }
0x15df   :  { %v3370_v5 = vpop.eup %3369 }
0x15e0   :  { %1912 = vrot.lane.b32.xlu0 %v3370_v5, %s3457_s30  ;;  %v2325_v5 = vunpack.c.0.s8 %v2324_v3 }
0x15e4   :  { %1950 = vrot.lane.b32.xlu0 %v1946_v7, %s3458_s12  ;;  %v2327_v7 = vshrl.u32 %v2326_v4, 7 }
0x1652   :  { %v1913_v10 = vpop.permute.xlu0 %1912 }
0x1653   :  { %v1915_v14 = vmul.f32 %v1913_v10, %v1910_v9 }
0x1655   :  { %v1917_v15 = vadd.f32 %v1916_v12, %v1915_v14 }
0x1656   :  { %v1951_v29 = vpop.permute.xlu0 %1950 }
0x1657   :  { %1927 = vrot.lane.b32.xlu1 %v1917_v15, %s3457_s30  ;;  %v3971_v35 = vsel %vm77_vm0, %v1944_v32, %v1951_v29 }
0x165b   :  { %1952 = vrot.lane.b32.xlu1 %v1947_v16, %s3458_s12 }
0x16a2   :  { %v2037_v21 = vpop.f32.mrb[16].mxu0 }
0x16a3   :  { %v2038_v25 = vadd.f32 %v2694_v17, %v2037_v21  ;;  %v3045_v26 = vpop.f32.mrb[17].mxu0 }
0x16a5   :  { %3046 = vmatprep.subr.msk.mxu1 %vm2048_vm5, %v2038_v25 }
0x16a6   :  { %3047 = vmatpush3.msk.msra.mxu1 %vm2048_vm5, %v2038_v25 }
0x16a7   :  { %3049 = vmatmul.mubr.msk.f32.vlgmr.msra.gmra.mrb[20].mxu1 %vm2041_vm4, %v3960_v30  ;;  %3227 = vmatprep.subr.bf16.mxu1 %v3226_v28 }
0x16a8   :  { %3067 = vmatprep.mubr.msk.f32.mxu1 %vm2135_vm6, %v3971_v35  ;;  %3229 = vmatpush3.bf16.msra.mxu1 %v3226_v28 }
0x16a9   :  { %3231 = vmatprep.subr.bf16.mxu1 %v3230_v31 }
0x16ac   :  { %3233 = vmatpush3.bf16.msra.mxu1 %v3230_v31  ;;  %v2509_v31 = vld [vmem:[%s4108_s16 + $0x8] sm:$0xff] }
0x16ad   :  { %3235 = vmatprep.subr.bf16.mxu1 %v3234_v36 }
0x16b0   :  { %3237 = vmatpush3.bf16.msra.mxu1 %v3234_v36 }
0x16b1   :  { %3239 = vmatprep.subr.bf16.mxu1 %v3238_v39 }
0x16b4   :  { %3241 = vmatpush3.bf16.msra.mxu1 %v3238_v39  ;;  %v3255_v39 = vpack.c.bf16 %v2513_v38, %v2512_v37 }
0x16c9   :  { %v1928_v41 = vpop.permute.xlu1 %1927 }
0x16ca   :  { %1930 = vst.msk [vmem:[#allocation4 + $0xe] sm:$0x3] %vm473_vm3, %v1928_v41  ;;  %1936 = vst.msk [vmem:[#allocation8] sm:$0x3] %vm473_vm3, %v1928_v41  ;;  %v2514_v41 = vld [vmem:[%s4108_s16 + $0x30] sm:$0xff] }
0x16cd   :  { %v1953_v43 = vpop.permute.xlu1 %1952 }
0x16d1   :  { %v1945_v42 = vld [vmem:[#allocation4 + $0x8] sm:$0xff] }
0x16d2   :  { %v3986_v40 = vsel %vm77_vm0, %v1945_v42, %v1953_v43 }
0x16d3   :  { %3068 = vmatmul.mubr.msk.f32.vlgmr.msra.gmra.mrb[20].mxu1 %vm2135_vm6, %v3986_v40 }
0x17a6   :  { %v3069_v44 = vpop.f32.mrb[20].mxu1 }
0x17a7   :  { %3371 = vtanh.f32 %v3069_v44  ;;  %v2208_v45 = vpop.f32.mrb[21].mxu1  ;;  %v2707_v44 = vld [vmem:[%s4109_s17] ss:$0 sm:$0xff] }
0x17a8   :  { %3373 = vtanh.f32 %v2208_v45 }
0x17b1   :  { %v3372_v47 = vpop.eup %3371 }
0x17b2   :  { %v3374_v48 = vpop.eup %3373  ;;  %v2227_v49 = vmul.f32 %v3372_v47, %v2701_v46 }
0x17b3   :  { %v2226_v50 = vmul.f32 %v3374_v48, %v2701_v46 }
0x17b4   :  { %v2231_v51 = vsel %vm77_vm0, %v2227_v49, 0.0 }
0x17b5   :  { %2232 = vadd.xlane.f32.xlu1 %v2231_v51  ;;  %v2228_v53 = vsel %vm77_vm0, %v2226_v50, 0.0 }
0x17b6   :  { %2229 = vadd.xlane.f32.xlu0 %v2228_v53 }
0x1842   :  { %v2233_v55 = vpop.xlane.xlu1 %2232 }
0x1843   :  { %v2235_v56 = vmul.f32 %v2233_v55, %v1943_v54  ;;  %v2230_v57 = vpop.xlane.xlu0 %2229 }
0x1844   :  { %v2234_v27 = vmul.f32 %v2230_v57, %v1942_v24 }
0x1846   :  { %v3243_v58 = vpack.c.bf16 %v2235_v56, %v2234_v27 }
0x1848   :  { %3244 = vmatpush3.bf16.msra.mxu0 %v3243_v58 }
0x184b   :  { %3075 = vmatmul.mubr.msk.f32.vlgmr.msra.gmra.mrb[18].mxu0 %vm2236_vm7, %v1941_v59 }
0x184c   :  { %3079 = vmatprep.mubr.msk.f32.mxu0 %vm2041_vm4, %v3935_v8  ;;  %v2328_v8 = vsub.s32 %v2325_v5, %v2327_v7 }
0x191e   :  { %v2306_v60 = vpop.f32.mrb[18].mxu0 }
0x191f   :  { %v3076_v61 = vpop.f32.mrb[19].mxu0  ;;  %v2311_v62 = vsel %vm2310_vm8, %v2306_v60, -inf }
0x1920   :  { %2312 = vmax.xlane.f32.xlu0 %v2311_v62 }
0x19ad   :  { %v2313_v63 = vpop.xlane.xlu0 %2312 }
0x19ae   :  { %v2314_v0 = vsub.f32 %v2306_v60, %v2313_v63 }
0x19b0   :  { %v2315_v13 = vmul.f32 1.442695, %v2314_v0 }
0x19b2   :  { %3375 = vpow2.f32 %v2315_v13 }
0x19bc   :  { %v3376_v1 = vpop.eup %3375 }
0x19bd   :  { %v2317_v52 = vsel %vm2310_vm8, %v3376_v1, 0.0 }
0x19be   :  { %2318 = vadd.xlane.f32.xlu0 %v2317_v52 }
0x1a4b   :  { %v2319_v2 = vpop.xlane.xlu0 %2318 }
0x1a4c   :  { %3377 = vrcp.f32 %v2319_v2 }
0x1a56   :  { %v3378_v9 = vpop.eup %3377 }
0x1a57   :  { %v2321_v10 = vmul.f32 %v3378_v9, %v3376_v1 }
0x1a59   :  { %v2329_v12 = vrot.slane %v2321_v10, %v2328_v8  ;;  %3077 = vmatprep.subr.msk.mxu0 %vm2048_vm5, %v2321_v10 }
0x1a5a   :  { %3078 = vmatpush3.msk.msra.mxu0 %vm2048_vm5, %v2321_v10 }
0x1a5b   :  { %3080 = vmatmul.mubr.msk.f32.vlgmr.msra.gmra.mrb[20].mxu0 %vm2041_vm4, %v3960_v30  ;;  %3245 = vmatprep.subr.bf16.mxu0 %v3453_v6  ;;  %v2330_v14 = vcombine.high %v2329_v12, %v2329_v12  ;;  %v2337_v15 = vrot.slane %v2329_v12, %v2328_v8  ;;  %v2508_v30 = vld [vmem:[%s4108_s16] sm:$0xff] }
0x1a5c   :  { %3086 = vmatprep.mubr.msk.f32.mxu0 %vm3454_vm1, %v3455_v11  ;;  %v3249_v33 = vpack.c.bf16 %v2509_v31, %v2508_v30 }
0x1a5d   :  { %v2344_v16 = vrot.slane %v2330_v14, %v2328_v8  ;;  %2348 = vst.msk [vmem:[#allocation10] sm:$0x1] %vm2347_vm9, %v2337_v15 }
0x1a5f   :  { %2349 = vst.msk [vmem:[#allocation10 + $0x1] sm:$0x1] %vm2347_vm9, %v2344_v16 }
0x1b2e   :  { %v3081_v17 = vpop.f32.mrb[20].mxu0 }
0x1b2f   :  { %v2428_v18 = vmul.f32 %v3081_v17, %v1943_v54  ;;  %v2418_v20 = vpop.f32.mrb[21].mxu0 }
0x1b30   :  { %v2427_v21 = vmul.f32 %v2418_v20, %v1942_v24 }
0x1b31   :  { %v2433_v22 = vsel %vm2429_vm10, %v2428_v18, 0.0 }
0x1b32   :  { %2434 = vadd.xlane.f32.xlu0 %v2433_v22  ;;  %v2430_v23 = vsel %vm2429_vm10, %v2427_v21, 0.0 }
0x1b33   :  { %2431 = vadd.xlane.f32.xlu1 %v2430_v23 }
0x1bbf   :  { %v2435_v25 = vpop.xlane.xlu0 %2434 }
0x1bc0   :  { %v2437_v26 = vmul.f32 %v2435_v25, %v3986_v40  ;;  %v2432_v28 = vpop.xlane.xlu1 %2431 }
0x1bc1   :  { %v2436_v29 = vmul.f32 %v2432_v28, %v3971_v35  ;;  %v2511_v35 = vld [vmem:[%s4108_s16 + $0x18] sm:$0xff] }
0x1bc2   :  { %v3252_v36 = vpack.c.bf16 %v2511_v35, %v2510_v34 }
0x1bc3   :  { %v3246_v32 = vpack.c.bf16 %v2437_v26, %v2436_v29 }
0x1bc5   :  { %3247 = vmatpush3.bf16.msra.mxu0 %v3246_v32 }
0x1bc6   :  { %3248 = vmatprep.subr.bf16.mxu0 %v3453_v6 }
0x1bc8   :  { %3087 = vmatmul.mubr.msk.f32.vlgmr.msra.gmra.mrb[22].mxu0 %vm2236_vm7, %v1941_v59 }
0x1bc9   :  { %3250 = vmatpush3.bf16.msra.mxu0 %v3249_v33  ;;  %3105 = vmatprep.mubr.msk.f32.mxu0 %vm3454_vm1, %v3455_v11  ;;  %v2515_v11 = vld [vmem:[%s4108_s16 + $0x38] sm:$0xff]  ;;  %s3460_s16 = smov [#allocation8]  }
0x1bca   :  { %3251 = vmatprep.subr.bf16.mxu0 %v3453_v6  ;;  %v3258_v42 = vpack.c.bf16 %v2515_v11, %v2514_v41  ;;  %s2626_s2 = sshll.u32 %s3460_s16, 4  ;;  %s2627_s2 = int_to_ptr.vmem [resolvable:$true] %s2626_s2 }
0x1bcb   :  { %s3383_s25 = scalar_lea.vmem %s2627_s2, 64  ;;  %p3388_p1 = scmp.lt.s32.totalorder %s2627_s2, %s2627_s2 }
0x1bcc   :  { %p3384_p0 = scmp.ne.s32.totalorder %s2627_s2, %s3383_s25  ;;  %p3389_p2 = scmp.lt.s32.totalorder %s3383_s25, %s3383_s25 }
0x1bcd   :  { %3253 = vmatpush3.bf16.msra.mxu0 %v3252_v36 }
0x1bce   :  { %3254 = vmatprep.subr.bf16.mxu0 %v3453_v6  ;;  %p3390_p3 = por %p3389_p2, %p3388_p1 }
0x1bd0   :  { %p3391_p4 = pnand %p3390_p3, %p3384_p0 }
0x1bd1   :  { %3256 = vmatpush3.bf16.msra.mxu0 %v3255_v39 }
0x1bd2   :  { %3257 = vmatprep.subr.bf16.mxu0 %v3453_v6 }
0x1bd5   :  { %3259 = vmatpush3.bf16.msra.mxu0 %v3258_v42 }
0x1c9b   :  { %v2504_v43 = vpop.f32.mrb[22].mxu0 }
0x1c9c   :  { %3106 = vmatmul.mubr.msk.f32.vlgmr.msra.gmra.mrb[24].mxu0 %vm2135_vm6, %v2504_v43  ;;  %v3088_v40 = vpop.f32.mrb[23].mxu0 }
0x1d6f   :  { %v2592_v45 = vpop.f32.mrb[24].mxu0 }
0x1d70   :  { %v2593_v46 = vadd.f32 %v2707_v44, %v2592_v45  ;;  %v3107_v47 = vpop.f32.mrb[25].mxu0 }
0x1d72   :  { %v2597_v48 = vsel %vm2596_vm11, %v2593_v46, -inf }
0x1d73   :  { %2598 = vmax.xlane.f32.xlu1 %v2597_v48 }
0x1e00   :  { %v2599_v49 = vpop.xlane.xlu1 %2598 }
0x1e01   :  { %v2600_v50 = vsub.f32 %v2593_v46, %v2599_v49 }
0x1e03   :  { %v2601_v51 = vmul.f32 1.442695, %v2600_v50 }
0x1e05   :  { %3379 = vpow2.f32 %v2601_v51 }
0x1e0f   :  { %v3380_v6 = vpop.eup %3379 }
0x1e10   :  { %v2603_v53 = vsel %vm2596_vm11, %v3380_v6, 0.0 }
0x1e11   :  { %2604 = vadd.xlane.f32.xlu0 %v2603_v53 }
0x1e12   :  { %3394 = shalt.err (!%p3391_p4)
}
0x1e13   :  { %s3395_s3 = scalar_lea.hbm %s4111_s19, 64 }
0x1e14   :  { %p3396_p5 = scmp.ne.s32.totalorder %s4111_s19, %s3395_s3  ;;  %p3399_p6 = scmp.lt.u32.totalorder %s3395_s3, %s4111_s19 }
0x1e16   :  { %p3401_p7 = pnand %p3399_p6, %p3396_p5 }
0x1e18   :  { %3404 = shalt.err (!%p3401_p7)
}
0x1e19   :  { %s3461_s28 = smov 2   ;;  %s3462_s11 = smov [#allocation10]  }
0x1e1a   :  { %2632 = dma.vmem_to_hbm [thread:$0]  %s2627_s2, 64, %s4111_s19, [#allocation9], %s3458_s12, %s3458_s12, %s3461_s28  }
0x1e1b   :  { %s2638_s14 = sshll.u32 %s3462_s11, 4  ;;  %s2639_s14 = int_to_ptr.vmem [resolvable:$true] %s2638_s14 }
0x1e1c   :  { %s3405_s30 = scalar_lea.vmem %s2639_s14, 32  ;;  %p3410_p9 = scmp.lt.s32.totalorder %s2639_s14, %s2639_s14 }
0x1e1d   :  { %p3406_p8 = scmp.ne.s32.totalorder %s2639_s14, %s3405_s30  ;;  %p3411_p10 = scmp.lt.s32.totalorder %s3405_s30, %s3405_s30 }
0x1e1f   :  { %p3412_p11 = por %p3411_p10, %p3410_p9 }
0x1e21   :  { %p3413_p12 = pnand %p3412_p11, %p3406_p8 }
0x1e23   :  { %3416 = shalt.err (!%p3413_p12)
}
0x1e24   :  { %s3417_s21 = scalar_lea.hbm %s4112_s20, 32 }
0x1e25   :  { %p3418_p13 = scmp.ne.s32.totalorder %s4112_s20, %s3417_s21  ;;  %p3421_p0 = scmp.lt.u32.totalorder %s3417_s21, %s4112_s20 }
0x1e27   :  { %p3423_p1 = pnand %p3421_p0, %p3418_p13 }
0x1e29   :  { %3426 = shalt.err (!%p3423_p1)
}
0x1e2a   :  { %s3463_s12 = smov 16   ;;  %s3464_s22 = smov 1  }
0x1e2b   :  { %2644 = dma.vmem_to_hbm [thread:$0]  %s2639_s14, 32, %s4112_s20, [#allocation9], %s3463_s12, %s3463_s12, %s3464_s22  }
0x1e2c   :  { %s3465_s23 = smov [#allocation6]  }
0x1e2d   :  { %s2617_s24 = sshll.u32 %s3465_s23, 4  ;;  %s2618_s24 = int_to_ptr.vmem [resolvable:$true] %s2617_s24 }
0x1e2e   :  { %s3427_s16 = scalar_lea.vmem %s2618_s24, 32  ;;  %p3432_p3 = scmp.lt.s32.totalorder %s2618_s24, %s2618_s24 }
0x1e2f   :  { %p3428_p2 = scmp.ne.s32.totalorder %s2618_s24, %s3427_s16  ;;  %p3433_p4 = scmp.lt.s32.totalorder %s3427_s16, %s3427_s16 }
0x1e31   :  { %p3434_p5 = por %p3433_p4, %p3432_p3 }
0x1e33   :  { %p3435_p6 = pnand %p3434_p5, %p3428_p2 }
0x1e9e   :  { %v2605_v54 = vpop.xlane.xlu0 %2604 }
0x1e9f   :  { %3381 = vlog2.f32 %v2605_v54 }
0x1ea9   :  { %v3382_v24 = vpop.eup %3381 }
0x1eaa   :  { %v2607_v55 = vmul.f32 0.6931472, %v3382_v24 }
0x1eac   :  { %v2608_v56 = vadd.f32 %v2607_v55, %v2599_v49 }
0x1eae   :  { %v2609_v57 = vsub.f32 %v2593_v46, %v2608_v56 }
0x1eb0   :  { %2610 = vst.msk [vmem:[#allocation6] sm:$0x3] %vm2596_vm11, %v2609_v57 }
0x1eb1   :  { %3438 = shalt.err (!%p3435_p6)
}
0x1eb2   :  { %s3439_s25 = scalar_lea.hbm %s4110_s18, 32 }
0x1eb3   :  { %p3440_p7 = scmp.ne.s32.totalorder %s4110_s18, %s3439_s25  ;;  %p3443_p8 = scmp.lt.u32.totalorder %s3439_s25, %s4110_s18 }
0x1eb5   :  { %p3445_p9 = pnand %p3443_p8, %p3440_p7 }
0x1eb7   :  { %3448 = shalt.err (!%p3445_p9)
}
0x1eb8   :  { %2620 = dma.vmem_to_hbm [thread:$0]  %s2618_s24, 32, %s4110_s18, [#allocation7]  }
0x1eb9   :  { %3449 = dma.done.wait [#allocation7], 32  }
0x1eba   :  { %3450 = vsyncadd [#allocation7], 4294967264 }
0x1ebb   :  { %3451 = dma.done.wait [#allocation9], 96  }
0x1ebc   :  { %3452 = vsyncadd [#allocation9], 4294967200 }
0x1ebd   :  { %2654 = vsyncpa [#allocation7], 1 }
0x1ebe   :  { %2655 = vsyncpa [#allocation9], 1 }

</bundles_post_ra>
